<compile_context>
chip_gen: v7x
topology: tpu7x:2x2x1
jax: 0.10.0
libtpu: 0.0.40
codegen_flags: <defaults>
</compile_context>

<pallas_src>
import functools

import jax
import jax.numpy as jnp
import numpy as np
from jax import lax
from jax.experimental import pallas as pl
from jax.experimental.pallas import tpu as pltpu

_LANE = 128     # TPU lane width
_SUBLANE = 8    # TPU sublane count


def _round_up(x, m):
    return (x + m - 1) // m * m


def _padded_bytes(shape, itemsize=4):
    """Rough VMEM footprint of one f32 array ((8,128)-padded last two dims)."""
    s = list(shape)
    if len(s) == 1:
        s = [1] + s
    s[-1] = _round_up(s[-1], _LANE)
    s[-2] = _round_up(s[-2], _SUBLANE)
    n = itemsize
    for d in s:
        n *= d
    return n


# ----------------------------- Pallas kernel --------------------------------


def _make_fused_lstm_kernel(num_layers, seq_len, batch_p, hidden):
    """Build the fused (all LSTM layers + FC) forward kernel.

    Positional ref layout:
      inputs : x (T*Bp, D0), h0 (L, Bp, H), c0 (L, Bp, H),
               [w_ih_l (Din,4H), w_hh_l (H,4H), b_l (1,4H)] * L,
               fc_w (H, O), fc_b (1, O)
      outputs: out (Bp, O), hn (L, Bp, H), cn (L, Bp, H)
      scratch: gx (T*Bp, 4H)      # layer-0 hoisted input projection
    Packed gate order is [i, f, o, g].
    """
    L, T, Bp, H = num_layers, seq_len, batch_p, hidden

    def kernel(*refs):
        x_ref, h0_ref, c0_ref = refs[0:3]
        w_refs = refs[3:3 + 3 * L]
        fc_w_ref = refs[3 + 3 * L]
        fc_b_ref = refs[4 + 3 * L]
        out_ref = refs[5 + 3 * L]
        hn_ref = refs[6 + 3 * L]
        cn_ref = refs[7 + 3 * L]
        gx_sc = refs[8 + 3 * L]

        # Running recurrent state lives directly in the output refs (VMEM).
        hn_ref[...] = h0_ref[...]
        cn_ref[...] = c0_ref[...]

        # Layer-0 input projection hoisted off the serial path; bias folded in.
        gx_sc[...] = (jnp.dot(x_ref[...], w_refs[0][...],
                              preferred_element_type=jnp.float32)
                      + w_refs[2][...])                       # (T*Bp, 4H)

        def cell(g_pre, c):
            # One fused sigmoid over [i, f, o] lanes, one tanh over [g] lanes.
            sig = jax.nn.sigmoid(g_pre[:, :3 * H])
            i_g = sig[:, 0 * H:1 * H]
            f_g = sig[:, 1 * H:2 * H]
            o_g = sig[:, 2 * H:3 * H]
            g_g = jnp.tanh(g_pre[:, 3 * H:4 * H])
            c_new = f_g * c + i_g * g_g
            h_new = o_g * jnp.tanh(c_new)
            return h_new, c_new

        # Wavefront schedule: step s runs layer l at time t = s - l.
        # Layers are processed in DECREASING l so layer l reads layer l-1's
        # hidden from wavefront step s-1 before layer l-1 overwrites it.
        # T is small & static -> fully unrolled Python loop (static slices).
        for s in range(T + L - 1):
            for l in range(L - 1, -1, -1):
                t = s - l
                if t < 0 or t >= T:
                    continue
                w_hh_ref = w_refs[3 * l + 1]
                h_prev = hn_ref[l]                            # (Bp, H)
                if l == 0:
                    g_pre = (gx_sc[t * Bp:(t + 1) * Bp, :]
                             + jnp.dot(h_prev, w_hh_ref[...],
                                       preferred_element_type=jnp.float32))
                else:
                    xin = hn_ref[l - 1]   # layer l-1 output at time t
                    g_pre = (jnp.dot(xin, w_refs[3 * l][...],
                                     preferred_element_type=jnp.float32)
                             + jnp.dot(h_prev, w_hh_ref[...],
                                       preferred_element_type=jnp.float32)
                             + w_refs[3 * l + 2][...])
                h_new, c_new = cell(g_pre, cn_ref[l])
                hn_ref[l] = h_new
                cn_ref[l] = c_new

        # Fused FC epilogue on h_n[-1]; dropout is eval-mode identity.
        out_ref[...] = (jnp.dot(hn_ref[L - 1], fc_w_ref[...],
                                preferred_element_type=jnp.float32)
                        + fc_b_ref[...]).astype(out_ref.dtype)

    return kernel


# --------------------------- One-time weight prep ----------------------------


def _reorder_gates(w, H):
    """PyTorch gate order [i, f, g, o] -> kernel order [i, f, o, g]."""
    return jnp.concatenate(
        [w[:, :2 * H], w[:, 3 * H:4 * H], w[:, 2 * H:3 * H]], axis=1)


def pack_params(params, num_layers):
    """One-time packing: gate reorder for every LSTM weight/bias.

    Done once at init so the per-call forward graph contains no weight
    re-layout ops (perf review item #1).
    """
    H = params["layers"][0][1].shape[0]
    packed = {"layers": [], "fc_w": params["fc_w"], "fc_b": params["fc_b"]}
    for l in range(num_layers):
        w_ih, w_hh, b = params["layers"][l]
        packed["layers"].append((_reorder_gates(w_ih, H),
                                 _reorder_gates(w_hh, H),
                                 _reorder_gates(b, H)))
    return packed


# ------------------------------ Wrapper --------------------------------------


@functools.partial(jax.jit, static_argnames=("num_layers",))
def lstm_forward(x, hidden, packed, *, num_layers):
    """Mirrors LSTM.forward(x, hidden) -> (out, (h_n, c_n)).

    x      : (B, T, input_size)       (PyTorch batch_first layout)
    hidden : (h0, c0) each (L, B, H)
    packed : output of pack_params()
    out    : (B, output_size)
    """
    h0_all, c0_all = hidden
    B, T, D0 = x.shape
    H = packed["layers"][0][1].shape[0]            # w_hh: (H, 4H)
    O = packed["fc_w"].shape[1]
    Bp = _round_up(B, _SUBLANE)

    # Per-call layout plumbing only: time-major, pad batch to 8 sublanes.
    x_t = jnp.transpose(x, (1, 0, 2))                        # (T, B, D0)
    x_p = jnp.pad(x_t, ((0, 0), (0, Bp - B), (0, 0)))        # (T, Bp, D0)
    x_p = x_p.reshape(T * Bp, D0)
    h0_p = jnp.pad(h0_all, ((0, 0), (0, Bp - B), (0, 0)))
    c0_p = jnp.pad(c0_all, ((0, 0), (0, Bp - B), (0, 0)))

    w_args = []
    for l in range(num_layers):
        w_args += list(packed["layers"][l])
    fc_w = packed["fc_w"]
    fc_b = packed["fc_b"]

    kernel = _make_fused_lstm_kernel(num_layers, T, Bp, H)
    n_in = 3 + 3 * num_layers + 2
    vmem = pl.BlockSpec(memory_space=pltpu.MemorySpace.VMEM)

    # VMEM footprint guard (v5e/v7x default scoped limits are 16/32 MiB).
    shapes = ([x_p.shape, h0_p.shape, c0_p.shape]
              + [w.shape for w in w_args]
              + [fc_w.shape, fc_b.shape]
              + [(Bp, O), (num_layers, Bp, H), (num_layers, Bp, H)]
              + [(T * Bp, 4 * H)])
    total_bytes = sum(_padded_bytes(s) for s in shapes)
    vmem_limit = int(min(96 * 2**20, max(32 * 2**20, 4 * total_bytes)))

    out_p, hn_p, cn_p = pl.pallas_call(
        kernel,
        out_shape=(jax.ShapeDtypeStruct((Bp, O), jnp.float32),
                   jax.ShapeDtypeStruct((num_layers, Bp, H), jnp.float32),
                   jax.ShapeDtypeStruct((num_layers, Bp, H), jnp.float32)),
        in_specs=[vmem] * n_in,
        out_specs=(vmem, vmem, vmem),
        scratch_shapes=[pltpu.VMEM((T * Bp, 4 * H), jnp.float32)],
        compiler_params=pltpu.CompilerParams(vmem_limit_bytes=vmem_limit),
    )(x_p, h0_p, c0_p, *w_args, fc_w, fc_b)

    out = out_p[:B]
    h_n = hn_p[:, :B, :]
    c_n = cn_p[:, :B, :]
    return out, (h_n, c_n)


# ----------------------- Pure-JAX reference (for check) ---------------------


def lstm_forward_ref(x, hidden, params, num_layers):
    """Reference uses the ORIGINAL (unpacked, PyTorch-ordered) params."""
    h0_all, c0_all = hidden
    layer_in = jnp.transpose(x, (1, 0, 2))   # (T, B, D)
    h_finals, c_finals = [], []
    for l in range(num_layers):
        w_ih, w_hh, b = params["layers"][l]
        H = w_hh.shape[0]

        def cell(carry, x_t):
            h, c = carry
            gates = x_t @ w_ih + h @ w_hh + b
            i_g = jax.nn.sigmoid(gates[:, 0 * H:1 * H])
            f_g = jax.nn.sigmoid(gates[:, 1 * H:2 * H])
            g_g = jnp.tanh(gates[:, 2 * H:3 * H])
            o_g = jax.nn.sigmoid(gates[:, 3 * H:4 * H])
            c_new = f_g * c + i_g * g_g
            h_new = o_g * jnp.tanh(c_new)
            return (h_new, c_new), h_new

        (hn, cn), ys = lax.scan(cell, (h0_all[l], c0_all[l]), layer_in)
        h_finals.append(hn)
        c_finals.append(cn)
        layer_in = ys
    h_n = jnp.stack(h_finals, axis=0)
    c_n = jnp.stack(c_finals, axis=0)
    out = h_n[-1] @ params["fc_w"] + params["fc_b"]
    return out, (h_n, c_n)


# ------------------------------ Param init -----------------------------------


def init_params(key, input_size, hidden_dim, num_layers, output_size):
    """PyTorch-style uniform(-1/sqrt(H), 1/sqrt(H)) init; weights stored
    pre-transposed to (D_in, 4H) / (H, 4H) with combined bias b_ih + b_hh,
    PyTorch gate order [i, f, g, o]."""
    params = {"layers": []}
    k_lstm = 1.0 / np.sqrt(hidden_dim)
    for l in range(num_layers):
        d_in = input_size if l == 0 else hidden_dim
        key, k1, k2, k3, k4 = jax.random.split(key, 5)
        w_ih = jax.random.uniform(k1, (d_in, 4 * hidden_dim),
                                  minval=-k_lstm, maxval=k_lstm,
                                  dtype=jnp.float32)
        w_hh = jax.random.uniform(k2, (hidden_dim, 4 * hidden_dim),
                                  minval=-k_lstm, maxval=k_lstm,
                                  dtype=jnp.float32)
        b_ih = jax.random.uniform(k3, (1, 4 * hidden_dim),
                                  minval=-k_lstm, maxval=k_lstm,
                                  dtype=jnp.float32)
        b_hh = jax.random.uniform(k4, (1, 4 * hidden_dim),
                                  minval=-k_lstm, maxval=k_lstm,
                                  dtype=jnp.float32)
        params["layers"].append((w_ih, w_hh, b_ih + b_hh))
    k_fc = 1.0 / np.sqrt(hidden_dim)
    key, k1, k2 = jax.random.split(key, 3)
    params["fc_w"] = jax.random.uniform(k1, (hidden_dim, output_size),
                                        minval=-k_fc, maxval=k_fc,
                                        dtype=jnp.float32)
    params["fc_b"] = jax.random.uniform(k2, (1, output_size),
                                        minval=-k_fc, maxval=k_fc,
                                        dtype=jnp.float32)
    return params


# --------------------------------- Main ------------------------------------


if __name__ == "__main__":
    # Module config: LSTM(mode, window_size, input_type, input_size=16,
    #                     output_size=4, hidden_dim=32, num_layers=2,
    #                     dropout=0.5, bidirectional=False)
    batch = 2
    seq_len = 8
    input_size = 16
    hidden_dim = 32
    num_layers = 2
    output_size = 4

    key = jax.random.PRNGKey(0)
    key, kx = jax.random.split(key)
    x = jax.random.normal(kx, (batch, seq_len, input_size), dtype=jnp.float32)

    # init_hidden(batch): zeros (num_layers, batch, hidden_dim) x2
    hidden = (jnp.zeros((num_layers, batch, hidden_dim), jnp.float32),
              jnp.zeros((num_layers, batch, hidden_dim), jnp.float32))

    params = init_params(key, input_size, hidden_dim, num_layers, output_size)
    packed = pack_params(params, num_layers)        # one-time weight prep

    out, (h_n, c_n) = lstm_forward(x, hidden, packed, num_layers=num_layers)
    jax.block_until_ready(out)
    jax.block_until_ready(h_n)
    jax.block_until_ready(c_n)

    # Correctness check against a pure-JAX reference (original params).
    out_r, (h_r, c_r) = lstm_forward_ref(x, hidden, params, num_layers)
    np.testing.assert_allclose(np.asarray(out), np.asarray(out_r),
                               rtol=1e-3, atol=1e-3)
    np.testing.assert_allclose(np.asarray(h_n), np.asarray(h_r),
                               rtol=1e-3, atol=1e-3)
    np.testing.assert_allclose(np.asarray(c_n), np.asarray(c_r),
                               rtol=1e-3, atol=1e-3)

    assert out.shape == (batch, output_size)
    assert h_n.shape == (num_layers, batch, hidden_dim)
    assert c_n.shape == (num_layers, batch, hidden_dim)

    print("KERNEL_OK")
</pallas_src>

<mosaic_0001>
module attributes {stable_mosaic.version = 11 : i64} {
  func.func @kernel(%arg0: memref<64x16xf32, #tpu.memory_space<vmem>>, %arg1: memref<2x8x32xf32, #tpu.memory_space<vmem>>, %arg2: memref<2x8x32xf32, #tpu.memory_space<vmem>>, %arg3: memref<16x128xf32, #tpu.memory_space<vmem>>, %arg4: memref<32x128xf32, #tpu.memory_space<vmem>>, %arg5: memref<1x128xf32, #tpu.memory_space<vmem>>, %arg6: memref<32x128xf32, #tpu.memory_space<vmem>>, %arg7: memref<32x128xf32, #tpu.memory_space<vmem>>, %arg8: memref<1x128xf32, #tpu.memory_space<vmem>>, %arg9: memref<32x4xf32, #tpu.memory_space<vmem>>, %arg10: memref<1x4xf32, #tpu.memory_space<vmem>>, %arg11: memref<8x4xf32, #tpu.memory_space<vmem>>, %arg12: memref<2x8x32xf32, #tpu.memory_space<vmem>>, %arg13: memref<2x8x32xf32, #tpu.memory_space<vmem>>, %arg14: memref<64x128xf32, #tpu.memory_space<vmem>>) attributes {dimension_semantics = [], scalar_prefetch = 0 : i64, scratch_operands = 1 : i64, tpu.core_type = #tpu.core_type<tc>} {
    %c0 = arith.constant 0 : index
    %c0_0 = arith.constant 0 : index
    %c0_1 = arith.constant 0 : index
    %0 = vector.load %arg1[%c0, %c0_0, %c0_1] : memref<2x8x32xf32, #tpu.memory_space<vmem>>, vector<2x8x32xf32>
    %c0_2 = arith.constant 0 : index
    %c0_3 = arith.constant 0 : index
    %c0_4 = arith.constant 0 : index
    %1 = vector.load %arg12[%c0_2, %c0_3, %c0_4] : memref<2x8x32xf32, #tpu.memory_space<vmem>>, vector<2x8x32xf32>
    tpu.vector_store %arg12[%c0_2, %c0_3, %c0_4], %0 {strides = array<i32>} : memref<2x8x32xf32, #tpu.memory_space<vmem>>, vector<2x8x32xf32>,
    %c0_5 = arith.constant 0 : index
    %c0_6 = arith.constant 0 : index
    %c0_7 = arith.constant 0 : index
    %2 = vector.load %arg2[%c0_5, %c0_6, %c0_7] : memref<2x8x32xf32, #tpu.memory_space<vmem>>, vector<2x8x32xf32>
    %c0_8 = arith.constant 0 : index
    %c0_9 = arith.constant 0 : index
    %c0_10 = arith.constant 0 : index
    %3 = vector.load %arg13[%c0_8, %c0_9, %c0_10] : memref<2x8x32xf32, #tpu.memory_space<vmem>>, vector<2x8x32xf32>
    tpu.vector_store %arg13[%c0_8, %c0_9, %c0_10], %2 {strides = array<i32>} : memref<2x8x32xf32, #tpu.memory_space<vmem>>, vector<2x8x32xf32>,
    %c0_11 = arith.constant 0 : index
    %c0_12 = arith.constant 0 : index
    %4 = vector.load %arg0[%c0_11, %c0_12] : memref<64x16xf32, #tpu.memory_space<vmem>>, vector<64x16xf32>
    %c0_13 = arith.constant 0 : index
    %c0_14 = arith.constant 0 : index
    %5 = vector.load %arg3[%c0_13, %c0_14] : memref<16x128xf32, #tpu.memory_space<vmem>>, vector<16x128xf32>
    %cst = arith.constant dense<0.000000e+00> : vector<64x128xf32>
    %6 = tpu.matmul %4, %5, %cst {dimension_numbers = #tpu.dot_dimension_numbers<[1], [0], [0], [1], [0, 0, 1, 1], [], []>} : vector<64x16xf32>, vector<16x128xf32>, vector<64x128xf32> -> vector<64x128xf32>
    %c0_15 = arith.constant 0 : index
    %c0_16 = arith.constant 0 : index
    %7 = vector.load %arg5[%c0_15, %c0_16] : memref<1x128xf32, #tpu.memory_space<vmem>>, vector<1x128xf32>
    %8 = vector.broadcast %7 : vector<1x128xf32> to vector<64x128xf32>
    %9 = arith.addf %6, %8 : vector<64x128xf32>
    %c0_17 = arith.constant 0 : index
    %c0_18 = arith.constant 0 : index
    %10 = vector.load %arg14[%c0_17, %c0_18] : memref<64x128xf32, #tpu.memory_space<vmem>>, vector<64x128xf32>
    tpu.vector_store %arg14[%c0_17, %c0_18], %9 {strides = array<i32>} : memref<64x128xf32, #tpu.memory_space<vmem>>, vector<64x128xf32>,
    %c0_19 = arith.constant 0 : index
    %c0_20 = arith.constant 0 : index
    %c0_21 = arith.constant 0 : index
    %11 = vector.load %arg12[%c0_19, %c0_20, %c0_21] : memref<2x8x32xf32, #tpu.memory_space<vmem>>, vector<1x8x32xf32>
    %12 = vector.shape_cast %11 : vector<1x8x32xf32> to vector<8x32xf32>
    %c0_22 = arith.constant 0 : index
    %c0_23 = arith.constant 0 : index
    %13 = vector.load %arg14[%c0_22, %c0_23] : memref<64x128xf32, #tpu.memory_space<vmem>>, vector<8x128xf32>
    %c0_24 = arith.constant 0 : index
    %c0_25 = arith.constant 0 : index
    %14 = vector.load %arg4[%c0_24, %c0_25] : memref<32x128xf32, #tpu.memory_space<vmem>>, vector<32x128xf32>
    %cst_26 = arith.constant dense<0.000000e+00> : vector<8x128xf32>
    %15 = tpu.matmul %12, %14, %cst_26 {dimension_numbers = #tpu.dot_dimension_numbers<[1], [0], [0], [1], [0, 0, 1, 1], [], []>} : vector<8x32xf32>, vector<32x128xf32>, vector<8x128xf32> -> vector<8x128xf32>
    %16 = arith.addf %13, %15 : vector<8x128xf32>
    %c0_27 = arith.constant 0 : index
    %c0_28 = arith.constant 0 : index
    %c0_29 = arith.constant 0 : index
    %17 = vector.load %arg13[%c0_27, %c0_28, %c0_29] : memref<2x8x32xf32, #tpu.memory_space<vmem>>, vector<1x8x32xf32>
    %18 = vector.shape_cast %17 : vector<1x8x32xf32> to vector<8x32xf32>
    %19 = vector.extract_strided_slice %16 {offsets = [0, 0], sizes = [8, 96], strides = [1, 1]} : vector<8x128xf32> to vector<8x96xf32>
    %20 = arith.negf %19 : vector<8x96xf32>
    %21 = math.exp %20 : vector<8x96xf32>
    %cst_30 = arith.constant 1.000000e+00 : f32
    %22 = vector.broadcast %cst_30 : f32 to vector<8x96xf32>
    %23 = arith.addf %22, %21 : vector<8x96xf32>
    %24 = arith.divf %22, %23 : vector<8x96xf32>
    %25 = vector.extract_strided_slice %24 {offsets = [0, 0], sizes = [8, 32], strides = [1, 1]} : vector<8x96xf32> to vector<8x32xf32>
    %26 = vector.extract_strided_slice %24 {offsets = [0, 32], sizes = [8, 32], strides = [1, 1]} : vector<8x96xf32> to vector<8x32xf32>
    %27 = vector.extract_strided_slice %24 {offsets = [0, 64], sizes = [8, 32], strides = [1, 1]} : vector<8x96xf32> to vector<8x32xf32>
    %28 = vector.extract_strided_slice %16 {offsets = [0, 96], sizes = [8, 32], strides = [1, 1]} : vector<8x128xf32> to vector<8x32xf32>
    %29 = math.tanh %28 : vector<8x32xf32>
    %30 = arith.mulf %26, %18 : vector<8x32xf32>
    %31 = arith.mulf %25, %29 : vector<8x32xf32>
    %32 = arith.addf %30, %31 : vector<8x32xf32>
    %33 = math.tanh %32 : vector<8x32xf32>
    %34 = arith.mulf %27, %33 : vector<8x32xf32>
    %c0_31 = arith.constant 0 : index
    %c0_32 = arith.constant 0 : index
    %c0_33 = arith.constant 0 : index
    %35 = vector.load %arg12[%c0_31, %c0_32, %c0_33] : memref<2x8x32xf32, #tpu.memory_space<vmem>>, vector<1x8x32xf32>
    %36 = vector.shape_cast %35 : vector<1x8x32xf32> to vector<8x32xf32>
    %37 = vector.shape_cast %34 : vector<8x32xf32> to vector<1x8x32xf32>
    tpu.vector_store %arg12[%c0_31, %c0_32, %c0_33], %37 {strides = array<i32>} : memref<2x8x32xf32, #tpu.memory_space<vmem>>, vector<1x8x32xf32>,
    %c0_34 = arith.constant 0 : index
    %c0_35 = arith.constant 0 : index
    %c0_36 = arith.constant 0 : index
    %38 = vector.load %arg13[%c0_34, %c0_35, %c0_36] : memref<2x8x32xf32, #tpu.memory_space<vmem>>, vector<1x8x32xf32>
    %39 = vector.shape_cast %38 : vector<1x8x32xf32> to vector<8x32xf32>
    %40 = vector.shape_cast %32 : vector<8x32xf32> to vector<1x8x32xf32>
    tpu.vector_store %arg13[%c0_34, %c0_35, %c0_36], %40 {strides = array<i32>} : memref<2x8x32xf32, #tpu.memory_space<vmem>>, vector<1x8x32xf32>,
    %c1 = arith.constant 1 : index
    %c0_37 = arith.constant 0 : index
    %c0_38 = arith.constant 0 : index
    %41 = vector.load %arg12[%c1, %c0_37, %c0_38] : memref<2x8x32xf32, #tpu.memory_space<vmem>>, vector<1x8x32xf32>
    %42 = vector.shape_cast %41 : vector<1x8x32xf32> to vector<8x32xf32>
    %c0_39 = arith.constant 0 : index
    %c0_40 = arith.constant 0 : index
    %c0_41 = arith.constant 0 : index
    %43 = vector.load %arg12[%c0_39, %c0_40, %c0_41] : memref<2x8x32xf32, #tpu.memory_space<vmem>>, vector<1x8x32xf32>
    %44 = vector.shape_cast %43 : vector<1x8x32xf32> to vector<8x32xf32>
    %c0_42 = arith.constant 0 : index
    %c0_43 = arith.constant 0 : index
    %45 = vector.load %arg6[%c0_42, %c0_43] : memref<32x128xf32, #tpu.memory_space<vmem>>, vector<32x128xf32>
    %cst_44 = arith.constant dense<0.000000e+00> : vector<8x128xf32>
    %46 = tpu.matmul %44, %45, %cst_44 {dimension_numbers = #tpu.dot_dimension_numbers<[1], [0], [0], [1], [0, 0, 1, 1], [], []>} : vector<8x32xf32>, vector<32x128xf32>, vector<8x128xf32> -> vector<8x128xf32>
    %c0_45 = arith.constant 0 : index
    %c0_46 = arith.constant 0 : index
    %47 = vector.load %arg7[%c0_45, %c0_46] : memref<32x128xf32, #tpu.memory_space<vmem>>, vector<32x128xf32>
    %cst_47 = arith.constant dense<0.000000e+00> : vector<8x128xf32>
    %48 = tpu.matmul %42, %47, %cst_47 {dimension_numbers = #tpu.dot_dimension_numbers<[1], [0], [0], [1], [0, 0, 1, 1], [], []>} : vector<8x32xf32>, vector<32x128xf32>, vector<8x128xf32> -> vector<8x128xf32>
    %49 = arith.addf %46, %48 : vector<8x128xf32>
    %c0_48 = arith.constant 0 : index
    %c0_49 = arith.constant 0 : index
    %50 = vector.load %arg8[%c0_48, %c0_49] : memref<1x128xf32, #tpu.memory_space<vmem>>, vector<1x128xf32>
    %51 = vector.broadcast %50 : vector<1x128xf32> to vector<8x128xf32>
    %52 = arith.addf %49, %51 : vector<8x128xf32>
    %c1_50 = arith.constant 1 : index
    %c0_51 = arith.constant 0 : index
    %c0_52 = arith.constant 0 : index
    %53 = vector.load %arg13[%c1_50, %c0_51, %c0_52] : memref<2x8x32xf32, #tpu.memory_space<vmem>>, vector<1x8x32xf32>
    %54 = vector.shape_cast %53 : vector<1x8x32xf32> to vector<8x32xf32>
    %55 = vector.extract_strided_slice %52 {offsets = [0, 0], sizes = [8, 96], strides = [1, 1]} : vector<8x128xf32> to vector<8x96xf32>
    %56 = arith.negf %55 : vector<8x96xf32>
    %57 = math.exp %56 : vector<8x96xf32>
    %cst_53 = arith.constant 1.000000e+00 : f32
    %58 = vector.broadcast %cst_53 : f32 to vector<8x96xf32>
    %59 = arith.addf %58, %57 : vector<8x96xf32>
    %60 = arith.divf %58, %59 : vector<8x96xf32>
    %61 = vector.extract_strided_slice %60 {offsets = [0, 0], sizes = [8, 32], strides = [1, 1]} : vector<8x96xf32> to vector<8x32xf32>
    %62 = vector.extract_strided_slice %60 {offsets = [0, 32], sizes = [8, 32], strides = [1, 1]} : vector<8x96xf32> to vector<8x32xf32>
    %63 = vector.extract_strided_slice %60 {offsets = [0, 64], sizes = [8, 32], strides = [1, 1]} : vector<8x96xf32> to vector<8x32xf32>
    %64 = vector.extract_strided_slice %52 {offsets = [0, 96], sizes = [8, 32], strides = [1, 1]} : vector<8x128xf32> to vector<8x32xf32>
    %65 = math.tanh %64 : vector<8x32xf32>
    %66 = arith.mulf %62, %54 : vector<8x32xf32>
    %67 = arith.mulf %61, %65 : vector<8x32xf32>
    %68 = arith.addf %66, %67 : vector<8x32xf32>
    %69 = math.tanh %68 : vector<8x32xf32>
    %70 = arith.mulf %63, %69 : vector<8x32xf32>
    %c1_54 = arith.constant 1 : index
    %c0_55 = arith.constant 0 : index
    %c0_56 = arith.constant 0 : index
    %71 = vector.load %arg12[%c1_54, %c0_55, %c0_56] : memref<2x8x32xf32, #tpu.memory_space<vmem>>, vector<1x8x32xf32>
    %72 = vector.shape_cast %71 : vector<1x8x32xf32> to vector<8x32xf32>
    %73 = vector.shape_cast %70 : vector<8x32xf32> to vector<1x8x32xf32>
    tpu.vector_store %arg12[%c1_54, %c0_55, %c0_56], %73 {strides = array<i32>} : memref<2x8x32xf32, #tpu.memory_space<vmem>>, vector<1x8x32xf32>,
    %c1_57 = arith.constant 1 : index
    %c0_58 = arith.constant 0 : index
    %c0_59 = arith.constant 0 : index
    %74 = vector.load %arg13[%c1_57, %c0_58, %c0_59] : memref<2x8x32xf32, #tpu.memory_space<vmem>>, vector<1x8x32xf32>
    %75 = vector.shape_cast %74 : vector<1x8x32xf32> to vector<8x32xf32>
    %76 = vector.shape_cast %68 : vector<8x32xf32> to vector<1x8x32xf32>
    tpu.vector_store %arg13[%c1_57, %c0_58, %c0_59], %76 {strides = array<i32>} : memref<2x8x32xf32, #tpu.memory_space<vmem>>, vector<1x8x32xf32>,
    %c0_60 = arith.constant 0 : index
    %c0_61 = arith.constant 0 : index
    %c0_62 = arith.constant 0 : index
    %77 = vector.load %arg12[%c0_60, %c0_61, %c0_62] : memref<2x8x32xf32, #tpu.memory_space<vmem>>, vector<1x8x32xf32>
    %78 = vector.shape_cast %77 : vector<1x8x32xf32> to vector<8x32xf32>
    %c8 = arith.constant 8 : index
    %c0_63 = arith.constant 0 : index
    %79 = vector.load %arg14[%c8, %c0_63] : memref<64x128xf32, #tpu.memory_space<vmem>>, vector<8x128xf32>
    %c0_64 = arith.constant 0 : index
    %c0_65 = arith.constant 0 : index
    %80 = vector.load %arg4[%c0_64, %c0_65] : memref<32x128xf32, #tpu.memory_space<vmem>>, vector<32x128xf32>
    %cst_66 = arith.constant dense<0.000000e+00> : vector<8x128xf32>
    %81 = tpu.matmul %78, %80, %cst_66 {dimension_numbers = #tpu.dot_dimension_numbers<[1], [0], [0], [1], [0, 0, 1, 1], [], []>} : vector<8x32xf32>, vector<32x128xf32>, vector<8x128xf32> -> vector<8x128xf32>
    %82 = arith.addf %79, %81 : vector<8x128xf32>
    %c0_67 = arith.constant 0 : index
    %c0_68 = arith.constant 0 : index
    %c0_69 = arith.constant 0 : index
    %83 = vector.load %arg13[%c0_67, %c0_68, %c0_69] : memref<2x8x32xf32, #tpu.memory_space<vmem>>, vector<1x8x32xf32>
    %84 = vector.shape_cast %83 : vector<1x8x32xf32> to vector<8x32xf32>
    %85 = vector.extract_strided_slice %82 {offsets = [0, 0], sizes = [8, 96], strides = [1, 1]} : vector<8x128xf32> to vector<8x96xf32>
    %86 = arith.negf %85 : vector<8x96xf32>
    %87 = math.exp %86 : vector<8x96xf32>
    %cst_70 = arith.constant 1.000000e+00 : f32
    %88 = vector.broadcast %cst_70 : f32 to vector<8x96xf32>
    %89 = arith.addf %88, %87 : vector<8x96xf32>
    %90 = arith.divf %88, %89 : vector<8x96xf32>
    %91 = vector.extract_strided_slice %90 {offsets = [0, 0], sizes = [8, 32], strides = [1, 1]} : vector<8x96xf32> to vector<8x32xf32>
    %92 = vector.extract_strided_slice %90 {offsets = [0, 32], sizes = [8, 32], strides = [1, 1]} : vector<8x96xf32> to vector<8x32xf32>
    %93 = vector.extract_strided_slice %90 {offsets = [0, 64], sizes = [8, 32], strides = [1, 1]} : vector<8x96xf32> to vector<8x32xf32>
    %94 = vector.extract_strided_slice %82 {offsets = [0, 96], sizes = [8, 32], strides = [1, 1]} : vector<8x128xf32> to vector<8x32xf32>
    %95 = math.tanh %94 : vector<8x32xf32>
    %96 = arith.mulf %92, %84 : vector<8x32xf32>
    %97 = arith.mulf %91, %95 : vector<8x32xf32>
    %98 = arith.addf %96, %97 : vector<8x32xf32>
    %99 = math.tanh %98 : vector<8x32xf32>
    %100 = arith.mulf %93, %99 : vector<8x32xf32>
    %c0_71 = arith.constant 0 : index
    %c0_72 = arith.constant 0 : index
    %c0_73 = arith.constant 0 : index
    %101 = vector.load %arg12[%c0_71, %c0_72, %c0_73] : memref<2x8x32xf32, #tpu.memory_space<vmem>>, vector<1x8x32xf32>
    %102 = vector.shape_cast %101 : vector<1x8x32xf32> to vector<8x32xf32>
    %103 = vector.shape_cast %100 : vector<8x32xf32> to vector<1x8x32xf32>
    tpu.vector_store %arg12[%c0_71, %c0_72, %c0_73], %103 {strides = array<i32>} : memref<2x8x32xf32, #tpu.memory_space<vmem>>, vector<1x8x32xf32>,
    %c0_74 = arith.constant 0 : index
    %c0_75 = arith.constant 0 : index
    %c0_76 = arith.constant 0 : index
    %104 = vector.load %arg13[%c0_74, %c0_75, %c0_76] : memref<2x8x32xf32, #tpu.memory_space<vmem>>, vector<1x8x32xf32>
    %105 = vector.shape_cast %104 : vector<1x8x32xf32> to vector<8x32xf32>
    %106 = vector.shape_cast %98 : vector<8x32xf32> to vector<1x8x32xf32>
    tpu.vector_store %arg13[%c0_74, %c0_75, %c0_76], %106 {strides = array<i32>} : memref<2x8x32xf32, #tpu.memory_space<vmem>>, vector<1x8x32xf32>,
    %c1_77 = arith.constant 1 : index
    %c0_78 = arith.constant 0 : index
    %c0_79 = arith.constant 0 : index
    %107 = vector.load %arg12[%c1_77, %c0_78, %c0_79] : memref<2x8x32xf32, #tpu.memory_space<vmem>>, vector<1x8x32xf32>
    %108 = vector.shape_cast %107 : vector<1x8x32xf32> to vector<8x32xf32>
    %c0_80 = arith.constant 0 : index
    %c0_81 = arith.constant 0 : index
    %c0_82 = arith.constant 0 : index
    %109 = vector.load %arg12[%c0_80, %c0_81, %c0_82] : memref<2x8x32xf32, #tpu.memory_space<vmem>>, vector<1x8x32xf32>
    %110 = vector.shape_cast %109 : vector<1x8x32xf32> to vector<8x32xf32>
    %c0_83 = arith.constant 0 : index
    %c0_84 = arith.constant 0 : index
    %111 = vector.load %arg6[%c0_83, %c0_84] : memref<32x128xf32, #tpu.memory_space<vmem>>, vector<32x128xf32>
    %cst_85 = arith.constant dense<0.000000e+00> : vector<8x128xf32>
    %112 = tpu.matmul %110, %111, %cst_85 {dimension_numbers = #tpu.dot_dimension_numbers<[1], [0], [0], [1], [0, 0, 1, 1], [], []>} : vector<8x32xf32>, vector<32x128xf32>, vector<8x128xf32> -> vector<8x128xf32>
    %c0_86 = arith.constant 0 : index
    %c0_87 = arith.constant 0 : index
    %113 = vector.load %arg7[%c0_86, %c0_87] : memref<32x128xf32, #tpu.memory_space<vmem>>, vector<32x128xf32>
    %cst_88 = arith.constant dense<0.000000e+00> : vector<8x128xf32>
    %114 = tpu.matmul %108, %113, %cst_88 {dimension_numbers = #tpu.dot_dimension_numbers<[1], [0], [0], [1], [0, 0, 1, 1], [], []>} : vector<8x32xf32>, vector<32x128xf32>, vector<8x128xf32> -> vector<8x128xf32>
    %115 = arith.addf %112, %114 : vector<8x128xf32>
    %c0_89 = arith.constant 0 : index
    %c0_90 = arith.constant 0 : index
    %116 = vector.load %arg8[%c0_89, %c0_90] : memref<1x128xf32, #tpu.memory_space<vmem>>, vector<1x128xf32>
    %117 = vector.broadcast %116 : vector<1x128xf32> to vector<8x128xf32>
    %118 = arith.addf %115, %117 : vector<8x128xf32>
    %c1_91 = arith.constant 1 : index
    %c0_92 = arith.constant 0 : index
    %c0_93 = arith.constant 0 : index
    %119 = vector.load %arg13[%c1_91, %c0_92, %c0_93] : memref<2x8x32xf32, #tpu.memory_space<vmem>>, vector<1x8x32xf32>
    %120 = vector.shape_cast %119 : vector<1x8x32xf32> to vector<8x32xf32>
    %121 = vector.extract_strided_slice %118 {offsets = [0, 0], sizes = [8, 96], strides = [1, 1]} : vector<8x128xf32> to vector<8x96xf32>
    %122 = arith.negf %121 : vector<8x96xf32>
    %123 = math.exp %122 : vector<8x96xf32>
    %cst_94 = arith.constant 1.000000e+00 : f32
    %124 = vector.broadcast %cst_94 : f32 to vector<8x96xf32>
    %125 = arith.addf %124, %123 : vector<8x96xf32>
    %126 = arith.divf %124, %125 : vector<8x96xf32>
    %127 = vector.extract_strided_slice %126 {offsets = [0, 0], sizes = [8, 32], strides = [1, 1]} : vector<8x96xf32> to vector<8x32xf32>
    %128 = vector.extract_strided_slice %126 {offsets = [0, 32], sizes = [8, 32], strides = [1, 1]} : vector<8x96xf32> to vector<8x32xf32>
    %129 = vector.extract_strided_slice %126 {offsets = [0, 64], sizes = [8, 32], strides = [1, 1]} : vector<8x96xf32> to vector<8x32xf32>
    %130 = vector.extract_strided_slice %118 {offsets = [0, 96], sizes = [8, 32], strides = [1, 1]} : vector<8x128xf32> to vector<8x32xf32>
    %131 = math.tanh %130 : vector<8x32xf32>
    %132 = arith.mulf %128, %120 : vector<8x32xf32>
    %133 = arith.mulf %127, %131 : vector<8x32xf32>
    %134 = arith.addf %132, %133 : vector<8x32xf32>
    %135 = math.tanh %134 : vector<8x32xf32>
    %136 = arith.mulf %129, %135 : vector<8x32xf32>
    %c1_95 = arith.constant 1 : index
    %c0_96 = arith.constant 0 : index
    %c0_97 = arith.constant 0 : index
    %137 = vector.load %arg12[%c1_95, %c0_96, %c0_97] : memref<2x8x32xf32, #tpu.memory_space<vmem>>, vector<1x8x32xf32>
    %138 = vector.shape_cast %137 : vector<1x8x32xf32> to vector<8x32xf32>
    %139 = vector.shape_cast %136 : vector<8x32xf32> to vector<1x8x32xf32>
    tpu.vector_store %arg12[%c1_95, %c0_96, %c0_97], %139 {strides = array<i32>} : memref<2x8x32xf32, #tpu.memory_space<vmem>>, vector<1x8x32xf32>,
    %c1_98 = arith.constant 1 : index
    %c0_99 = arith.constant 0 : index
    %c0_100 = arith.constant 0 : index
    %140 = vector.load %arg13[%c1_98, %c0_99, %c0_100] : memref<2x8x32xf32, #tpu.memory_space<vmem>>, vector<1x8x32xf32>
    %141 = vector.shape_cast %140 : vector<1x8x32xf32> to vector<8x32xf32>
    %142 = vector.shape_cast %134 : vector<8x32xf32> to vector<1x8x32xf32>
    tpu.vector_store %arg13[%c1_98, %c0_99, %c0_100], %142 {strides = array<i32>} : memref<2x8x32xf32, #tpu.memory_space<vmem>>, vector<1x8x32xf32>,
    %c0_101 = arith.constant 0 : index
    %c0_102 = arith.constant 0 : index
    %c0_103 = arith.constant 0 : index
    %143 = vector.load %arg12[%c0_101, %c0_102, %c0_103] : memref<2x8x32xf32, #tpu.memory_space<vmem>>, vector<1x8x32xf32>
    %144 = vector.shape_cast %143 : vector<1x8x32xf32> to vector<8x32xf32>
    %c16 = arith.constant 16 : index
    %c0_104 = arith.constant 0 : index
    %145 = vector.load %arg14[%c16, %c0_104] : memref<64x128xf32, #tpu.memory_space<vmem>>, vector<8x128xf32>
    %c0_105 = arith.constant 0 : index
    %c0_106 = arith.constant 0 : index
    %146 = vector.load %arg4[%c0_105, %c0_106] : memref<32x128xf32, #tpu.memory_space<vmem>>, vector<32x128xf32>
    %cst_107 = arith.constant dense<0.000000e+00> : vector<8x128xf32>
    %147 = tpu.matmul %144, %146, %cst_107 {dimension_numbers = #tpu.dot_dimension_numbers<[1], [0], [0], [1], [0, 0, 1, 1], [], []>} : vector<8x32xf32>, vector<32x128xf32>, vector<8x128xf32> -> vector<8x128xf32>
    %148 = arith.addf %145, %147 : vector<8x128xf32>
    %c0_108 = arith.constant 0 : index
    %c0_109 = arith.constant 0 : index
    %c0_110 = arith.constant 0 : index
    %149 = vector.load %arg13[%c0_108, %c0_109, %c0_110] : memref<2x8x32xf32, #tpu.memory_space<vmem>>, vector<1x8x32xf32>
    %150 = vector.shape_cast %149 : vector<1x8x32xf32> to vector<8x32xf32>
    %151 = vector.extract_strided_slice %148 {offsets = [0, 0], sizes = [8, 96], strides = [1, 1]} : vector<8x128xf32> to vector<8x96xf32>
    %152 = arith.negf %151 : vector<8x96xf32>
    %153 = math.exp %152 : vector<8x96xf32>
    %cst_111 = arith.constant 1.000000e+00 : f32
    %154 = vector.broadcast %cst_111 : f32 to vector<8x96xf32>
    %155 = arith.addf %154, %153 : vector<8x96xf32>
    %156 = arith.divf %154, %155 : vector<8x96xf32>
    %157 = vector.extract_strided_slice %156 {offsets = [0, 0], sizes = [8, 32], strides = [1, 1]} : vector<8x96xf32> to vector<8x32xf32>
    %158 = vector.extract_strided_slice %156 {offsets = [0, 32], sizes = [8, 32], strides = [1, 1]} : vector<8x96xf32> to vector<8x32xf32>
    %159 = vector.extract_strided_slice %156 {offsets = [0, 64], sizes = [8, 32], strides = [1, 1]} : vector<8x96xf32> to vector<8x32xf32>
    %160 = vector.extract_strided_slice %148 {offsets = [0, 96], sizes = [8, 32], strides = [1, 1]} : vector<8x128xf32> to vector<8x32xf32>
    %161 = math.tanh %160 : vector<8x32xf32>
    %162 = arith.mulf %158, %150 : vector<8x32xf32>
    %163 = arith.mulf %157, %161 : vector<8x32xf32>
    %164 = arith.addf %162, %163 : vector<8x32xf32>
    %165 = math.tanh %164 : vector<8x32xf32>
    %166 = arith.mulf %159, %165 : vector<8x32xf32>
    %c0_112 = arith.constant 0 : index
    %c0_113 = arith.constant 0 : index
    %c0_114 = arith.constant 0 : index
    %167 = vector.load %arg12[%c0_112, %c0_113, %c0_114] : memref<2x8x32xf32, #tpu.memory_space<vmem>>, vector<1x8x32xf32>
    %168 = vector.shape_cast %167 : vector<1x8x32xf32> to vector<8x32xf32>
    %169 = vector.shape_cast %166 : vector<8x32xf32> to vector<1x8x32xf32>
    tpu.vector_store %arg12[%c0_112, %c0_113, %c0_114], %169 {strides = array<i32>} : memref<2x8x32xf32, #tpu.memory_space<vmem>>, vector<1x8x32xf32>,
    %c0_115 = arith.constant 0 : index
    %c0_116 = arith.constant 0 : index
    %c0_117 = arith.constant 0 : index
    %170 = vector.load %arg13[%c0_115, %c0_116, %c0_117] : memref<2x8x32xf32, #tpu.memory_space<vmem>>, vector<1x8x32xf32>
    %171 = vector.shape_cast %170 : vector<1x8x32xf32> to vector<8x32xf32>
    %172 = vector.shape_cast %164 : vector<8x32xf32> to vector<1x8x32xf32>
    tpu.vector_store %arg13[%c0_115, %c0_116, %c0_117], %172 {strides = array<i32>} : memref<2x8x32xf32, #tpu.memory_space<vmem>>, vector<1x8x32xf32>,
    %c1_118 = arith.constant 1 : index
    %c0_119 = arith.constant 0 : index
    %c0_120 = arith.constant 0 : index
    %173 = vector.load %arg12[%c1_118, %c0_119, %c0_120] : memref<2x8x32xf32, #tpu.memory_space<vmem>>, vector<1x8x32xf32>
    %174 = vector.shape_cast %173 : vector<1x8x32xf32> to vector<8x32xf32>
    %c0_121 = arith.constant 0 : index
    %c0_122 = arith.constant 0 : index
    %c0_123 = arith.constant 0 : index
    %175 = vector.load %arg12[%c0_121, %c0_122, %c0_123] : memref<2x8x32xf32, #tpu.memory_space<vmem>>, vector<1x8x32xf32>
    %176 = vector.shape_cast %175 : vector<1x8x32xf32> to vector<8x32xf32>
    %c0_124 = arith.constant 0 : index
    %c0_125 = arith.constant 0 : index
    %177 = vector.load %arg6[%c0_124, %c0_125] : memref<32x128xf32, #tpu.memory_space<vmem>>, vector<32x128xf32>
    %cst_126 = arith.constant dense<0.000000e+00> : vector<8x128xf32>
    %178 = tpu.matmul %176, %177, %cst_126 {dimension_numbers = #tpu.dot_dimension_numbers<[1], [0], [0], [1], [0, 0, 1, 1], [], []>} : vector<8x32xf32>, vector<32x128xf32>, vector<8x128xf32> -> vector<8x128xf32>
    %c0_127 = arith.constant 0 : index
    %c0_128 = arith.constant 0 : index
    %179 = vector.load %arg7[%c0_127, %c0_128] : memref<32x128xf32, #tpu.memory_space<vmem>>, vector<32x128xf32>
    %cst_129 = arith.constant dense<0.000000e+00> : vector<8x128xf32>
    %180 = tpu.matmul %174, %179, %cst_129 {dimension_numbers = #tpu.dot_dimension_numbers<[1], [0], [0], [1], [0, 0, 1, 1], [], []>} : vector<8x32xf32>, vector<32x128xf32>, vector<8x128xf32> -> vector<8x128xf32>
    %181 = arith.addf %178, %180 : vector<8x128xf32>
    %c0_130 = arith.constant 0 : index
    %c0_131 = arith.constant 0 : index
    %182 = vector.load %arg8[%c0_130, %c0_131] : memref<1x128xf32, #tpu.memory_space<vmem>>, vector<1x128xf32>
    %183 = vector.broadcast %182 : vector<1x128xf32> to vector<8x128xf32>
    %184 = arith.addf %181, %183 : vector<8x128xf32>
    %c1_132 = arith.constant 1 : index
    %c0_133 = arith.constant 0 : index
    %c0_134 = arith.constant 0 : index
    %185 = vector.load %arg13[%c1_132, %c0_133, %c0_134] : memref<2x8x32xf32, #tpu.memory_space<vmem>>, vector<1x8x32xf32>
    %186 = vector.shape_cast %185 : vector<1x8x32xf32> to vector<8x32xf32>
    %187 = vector.extract_strided_slice %184 {offsets = [0, 0], sizes = [8, 96], strides = [1, 1]} : vector<8x128xf32> to vector<8x96xf32>
    %188 = arith.negf %187 : vector<8x96xf32>
    %189 = math.exp %188 : vector<8x96xf32>
    %cst_135 = arith.constant 1.000000e+00 : f32
    %190 = vector.broadcast %cst_135 : f32 to vector<8x96xf32>
    %191 = arith.addf %190, %189 : vector<8x96xf32>
    %192 = arith.divf %190, %191 : vector<8x96xf32>
    %193 = vector.extract_strided_slice %192 {offsets = [0, 0], sizes = [8, 32], strides = [1, 1]} : vector<8x96xf32> to vector<8x32xf32>
    %194 = vector.extract_strided_slice %192 {offsets = [0, 32], sizes = [8, 32], strides = [1, 1]} : vector<8x96xf32> to vector<8x32xf32>
    %195 = vector.extract_strided_slice %192 {offsets = [0, 64], sizes = [8, 32], strides = [1, 1]} : vector<8x96xf32> to vector<8x32xf32>
    %196 = vector.extract_strided_slice %184 {offsets = [0, 96], sizes = [8, 32], strides = [1, 1]} : vector<8x128xf32> to vector<8x32xf32>
    %197 = math.tanh %196 : vector<8x32xf32>
    %198 = arith.mulf %194, %186 : vector<8x32xf32>
    %199 = arith.mulf %193, %197 : vector<8x32xf32>
    %200 = arith.addf %198, %199 : vector<8x32xf32>
    %201 = math.tanh %200 : vector<8x32xf32>
    %202 = arith.mulf %195, %201 : vector<8x32xf32>
    %c1_136 = arith.constant 1 : index
    %c0_137 = arith.constant 0 : index
    %c0_138 = arith.constant 0 : index
    %203 = vector.load %arg12[%c1_136, %c0_137, %c0_138] : memref<2x8x32xf32, #tpu.memory_space<vmem>>, vector<1x8x32xf32>
    %204 = vector.shape_cast %203 : vector<1x8x32xf32> to vector<8x32xf32>
    %205 = vector.shape_cast %202 : vector<8x32xf32> to vector<1x8x32xf32>
    tpu.vector_store %arg12[%c1_136, %c0_137, %c0_138], %205 {strides = array<i32>} : memref<2x8x32xf32, #tpu.memory_space<vmem>>, vector<1x8x32xf32>,
    %c1_139 = arith.constant 1 : index
    %c0_140 = arith.constant 0 : index
    %c0_141 = arith.constant 0 : index
    %206 = vector.load %arg13[%c1_139, %c0_140, %c0_141] : memref<2x8x32xf32, #tpu.memory_space<vmem>>, vector<1x8x32xf32>
    %207 = vector.shape_cast %206 : vector<1x8x32xf32> to vector<8x32xf32>
    %208 = vector.shape_cast %200 : vector<8x32xf32> to vector<1x8x32xf32>
    tpu.vector_store %arg13[%c1_139, %c0_140, %c0_141], %208 {strides = array<i32>} : memref<2x8x32xf32, #tpu.memory_space<vmem>>, vector<1x8x32xf32>,
    %c0_142 = arith.constant 0 : index
    %c0_143 = arith.constant 0 : index
    %c0_144 = arith.constant 0 : index
    %209 = vector.load %arg12[%c0_142, %c0_143, %c0_144] : memref<2x8x32xf32, #tpu.memory_space<vmem>>, vector<1x8x32xf32>
    %210 = vector.shape_cast %209 : vector<1x8x32xf32> to vector<8x32xf32>
    %c24 = arith.constant 24 : index
    %c0_145 = arith.constant 0 : index
    %211 = vector.load %arg14[%c24, %c0_145] : memref<64x128xf32, #tpu.memory_space<vmem>>, vector<8x128xf32>
    %c0_146 = arith.constant 0 : index
    %c0_147 = arith.constant 0 : index
    %212 = vector.load %arg4[%c0_146, %c0_147] : memref<32x128xf32, #tpu.memory_space<vmem>>, vector<32x128xf32>
    %cst_148 = arith.constant dense<0.000000e+00> : vector<8x128xf32>
    %213 = tpu.matmul %210, %212, %cst_148 {dimension_numbers = #tpu.dot_dimension_numbers<[1], [0], [0], [1], [0, 0, 1, 1], [], []>} : vector<8x32xf32>, vector<32x128xf32>, vector<8x128xf32> -> vector<8x128xf32>
    %214 = arith.addf %211, %213 : vector<8x128xf32>
    %c0_149 = arith.constant 0 : index
    %c0_150 = arith.constant 0 : index
    %c0_151 = arith.constant 0 : index
    %215 = vector.load %arg13[%c0_149, %c0_150, %c0_151] : memref<2x8x32xf32, #tpu.memory_space<vmem>>, vector<1x8x32xf32>
    %216 = vector.shape_cast %215 : vector<1x8x32xf32> to vector<8x32xf32>
    %217 = vector.extract_strided_slice %214 {offsets = [0, 0], sizes = [8, 96], strides = [1, 1]} : vector<8x128xf32> to vector<8x96xf32>
    %218 = arith.negf %217 : vector<8x96xf32>
    %219 = math.exp %218 : vector<8x96xf32>
    %cst_152 = arith.constant 1.000000e+00 : f32
    %220 = vector.broadcast %cst_152 : f32 to vector<8x96xf32>
    %221 = arith.addf %220, %219 : vector<8x96xf32>
    %222 = arith.divf %220, %221 : vector<8x96xf32>
    %223 = vector.extract_strided_slice %222 {offsets = [0, 0], sizes = [8, 32], strides = [1, 1]} : vector<8x96xf32> to vector<8x32xf32>
    %224 = vector.extract_strided_slice %222 {offsets = [0, 32], sizes = [8, 32], strides = [1, 1]} : vector<8x96xf32> to vector<8x32xf32>
    %225 = vector.extract_strided_slice %222 {offsets = [0, 64], sizes = [8, 32], strides = [1, 1]} : vector<8x96xf32> to vector<8x32xf32>
    %226 = vector.extract_strided_slice %214 {offsets = [0, 96], sizes = [8, 32], strides = [1, 1]} : vector<8x128xf32> to vector<8x32xf32>
    %227 = math.tanh %226 : vector<8x32xf32>
    %228 = arith.mulf %224, %216 : vector<8x32xf32>
    %229 = arith.mulf %223, %227 : vector<8x32xf32>
    %230 = arith.addf %228, %229 : vector<8x32xf32>
    %231 = math.tanh %230 : vector<8x32xf32>
    %232 = arith.mulf %225, %231 : vector<8x32xf32>
    %c0_153 = arith.constant 0 : index
    %c0_154 = arith.constant 0 : index
    %c0_155 = arith.constant 0 : index
    %233 = vector.load %arg12[%c0_153, %c0_154, %c0_155] : memref<2x8x32xf32, #tpu.memory_space<vmem>>, vector<1x8x32xf32>
    %234 = vector.shape_cast %233 : vector<1x8x32xf32> to vector<8x32xf32>
    %235 = vector.shape_cast %232 : vector<8x32xf32> to vector<1x8x32xf32>
    tpu.vector_store %arg12[%c0_153, %c0_154, %c0_155], %235 {strides = array<i32>} : memref<2x8x32xf32, #tpu.memory_space<vmem>>, vector<1x8x32xf32>,
    %c0_156 = arith.constant 0 : index
    %c0_157 = arith.constant 0 : index
    %c0_158 = arith.constant 0 : index
    %236 = vector.load %arg13[%c0_156, %c0_157, %c0_158] : memref<2x8x32xf32, #tpu.memory_space<vmem>>, vector<1x8x32xf32>
    %237 = vector.shape_cast %236 : vector<1x8x32xf32> to vector<8x32xf32>
    %238 = vector.shape_cast %230 : vector<8x32xf32> to vector<1x8x32xf32>
    tpu.vector_store %arg13[%c0_156, %c0_157, %c0_158], %238 {strides = array<i32>} : memref<2x8x32xf32, #tpu.memory_space<vmem>>, vector<1x8x32xf32>,
    %c1_159 = arith.constant 1 : index
    %c0_160 = arith.constant 0 : index
    %c0_161 = arith.constant 0 : index
    %239 = vector.load %arg12[%c1_159, %c0_160, %c0_161] : memref<2x8x32xf32, #tpu.memory_space<vmem>>, vector<1x8x32xf32>
    %240 = vector.shape_cast %239 : vector<1x8x32xf32> to vector<8x32xf32>
    %c0_162 = arith.constant 0 : index
    %c0_163 = arith.constant 0 : index
    %c0_164 = arith.constant 0 : index
    %241 = vector.load %arg12[%c0_162, %c0_163, %c0_164] : memref<2x8x32xf32, #tpu.memory_space<vmem>>, vector<1x8x32xf32>
    %242 = vector.shape_cast %241 : vector<1x8x32xf32> to vector<8x32xf32>
    %c0_165 = arith.constant 0 : index
    %c0_166 = arith.constant 0 : index
    %243 = vector.load %arg6[%c0_165, %c0_166] : memref<32x128xf32, #tpu.memory_space<vmem>>, vector<32x128xf32>
    %cst_167 = arith.constant dense<0.000000e+00> : vector<8x128xf32>
    %244 = tpu.matmul %242, %243, %cst_167 {dimension_numbers = #tpu.dot_dimension_numbers<[1], [0], [0], [1], [0, 0, 1, 1], [], []>} : vector<8x32xf32>, vector<32x128xf32>, vector<8x128xf32> -> vector<8x128xf32>
    %c0_168 = arith.constant 0 : index
    %c0_169 = arith.constant 0 : index
    %245 = vector.load %arg7[%c0_168, %c0_169] : memref<32x128xf32, #tpu.memory_space<vmem>>, vector<32x128xf32>
    %cst_170 = arith.constant dense<0.000000e+00> : vector<8x128xf32>
    %246 = tpu.matmul %240, %245, %cst_170 {dimension_numbers = #tpu.dot_dimension_numbers<[1], [0], [0], [1], [0, 0, 1, 1], [], []>} : vector<8x32xf32>, vector<32x128xf32>, vector<8x128xf32> -> vector<8x128xf32>
    %247 = arith.addf %244, %246 : vector<8x128xf32>
    %c0_171 = arith.constant 0 : index
    %c0_172 = arith.constant 0 : index
    %248 = vector.load %arg8[%c0_171, %c0_172] : memref<1x128xf32, #tpu.memory_space<vmem>>, vector<1x128xf32>
    %249 = vector.broadcast %248 : vector<1x128xf32> to vector<8x128xf32>
    %250 = arith.addf %247, %249 : vector<8x128xf32>
    %c1_173 = arith.constant 1 : index
    %c0_174 = arith.constant 0 : index
    %c0_175 = arith.constant 0 : index
    %251 = vector.load %arg13[%c1_173, %c0_174, %c0_175] : memref<2x8x32xf32, #tpu.memory_space<vmem>>, vector<1x8x32xf32>
    %252 = vector.shape_cast %251 : vector<1x8x32xf32> to vector<8x32xf32>
    %253 = vector.extract_strided_slice %250 {offsets = [0, 0], sizes = [8, 96], strides = [1, 1]} : vector<8x128xf32> to vector<8x96xf32>
    %254 = arith.negf %253 : vector<8x96xf32>
    %255 = math.exp %254 : vector<8x96xf32>
    %cst_176 = arith.constant 1.000000e+00 : f32
    %256 = vector.broadcast %cst_176 : f32 to vector<8x96xf32>
    %257 = arith.addf %256, %255 : vector<8x96xf32>
    %258 = arith.divf %256, %257 : vector<8x96xf32>
    %259 = vector.extract_strided_slice %258 {offsets = [0, 0], sizes = [8, 32], strides = [1, 1]} : vector<8x96xf32> to vector<8x32xf32>
    %260 = vector.extract_strided_slice %258 {offsets = [0, 32], sizes = [8, 32], strides = [1, 1]} : vector<8x96xf32> to vector<8x32xf32>
    %261 = vector.extract_strided_slice %258 {offsets = [0, 64], sizes = [8, 32], strides = [1, 1]} : vector<8x96xf32> to vector<8x32xf32>
    %262 = vector.extract_strided_slice %250 {offsets = [0, 96], sizes = [8, 32], strides = [1, 1]} : vector<8x128xf32> to vector<8x32xf32>
    %263 = math.tanh %262 : vector<8x32xf32>
    %264 = arith.mulf %260, %252 : vector<8x32xf32>
    %265 = arith.mulf %259, %263 : vector<8x32xf32>
    %266 = arith.addf %264, %265 : vector<8x32xf32>
    %267 = math.tanh %266 : vector<8x32xf32>
    %268 = arith.mulf %261, %267 : vector<8x32xf32>
    %c1_177 = arith.constant 1 : index
    %c0_178 = arith.constant 0 : index
    %c0_179 = arith.constant 0 : index
    %269 = vector.load %arg12[%c1_177, %c0_178, %c0_179] : memref<2x8x32xf32, #tpu.memory_space<vmem>>, vector<1x8x32xf32>
    %270 = vector.shape_cast %269 : vector<1x8x32xf32> to vector<8x32xf32>
    %271 = vector.shape_cast %268 : vector<8x32xf32> to vector<1x8x32xf32>
    tpu.vector_store %arg12[%c1_177, %c0_178, %c0_179], %271 {strides = array<i32>} : memref<2x8x32xf32, #tpu.memory_space<vmem>>, vector<1x8x32xf32>,
    %c1_180 = arith.constant 1 : index
    %c0_181 = arith.constant 0 : index
    %c0_182 = arith.constant 0 : index
    %272 = vector.load %arg13[%c1_180, %c0_181, %c0_182] : memref<2x8x32xf32, #tpu.memory_space<vmem>>, vector<1x8x32xf32>
    %273 = vector.shape_cast %272 : vector<1x8x32xf32> to vector<8x32xf32>
    %274 = vector.shape_cast %266 : vector<8x32xf32> to vector<1x8x32xf32>
    tpu.vector_store %arg13[%c1_180, %c0_181, %c0_182], %274 {strides = array<i32>} : memref<2x8x32xf32, #tpu.memory_space<vmem>>, vector<1x8x32xf32>,
    %c0_183 = arith.constant 0 : index
    %c0_184 = arith.constant 0 : index
    %c0_185 = arith.constant 0 : index
    %275 = vector.load %arg12[%c0_183, %c0_184, %c0_185] : memref<2x8x32xf32, #tpu.memory_space<vmem>>, vector<1x8x32xf32>
    %276 = vector.shape_cast %275 : vector<1x8x32xf32> to vector<8x32xf32>
    %c32 = arith.constant 32 : index
    %c0_186 = arith.constant 0 : index
    %277 = vector.load %arg14[%c32, %c0_186] : memref<64x128xf32, #tpu.memory_space<vmem>>, vector<8x128xf32>
    %c0_187 = arith.constant 0 : index
    %c0_188 = arith.constant 0 : index
    %278 = vector.load %arg4[%c0_187, %c0_188] : memref<32x128xf32, #tpu.memory_space<vmem>>, vector<32x128xf32>
    %cst_189 = arith.constant dense<0.000000e+00> : vector<8x128xf32>
    %279 = tpu.matmul %276, %278, %cst_189 {dimension_numbers = #tpu.dot_dimension_numbers<[1], [0], [0], [1], [0, 0, 1, 1], [], []>} : vector<8x32xf32>, vector<32x128xf32>, vector<8x128xf32> -> vector<8x128xf32>
    %280 = arith.addf %277, %279 : vector<8x128xf32>
    %c0_190 = arith.constant 0 : index
    %c0_191 = arith.constant 0 : index
    %c0_192 = arith.constant 0 : index
    %281 = vector.load %arg13[%c0_190, %c0_191, %c0_192] : memref<2x8x32xf32, #tpu.memory_space<vmem>>, vector<1x8x32xf32>
    %282 = vector.shape_cast %281 : vector<1x8x32xf32> to vector<8x32xf32>
    %283 = vector.extract_strided_slice %280 {offsets = [0, 0], sizes = [8, 96], strides = [1, 1]} : vector<8x128xf32> to vector<8x96xf32>
    %284 = arith.negf %283 : vector<8x96xf32>
    %285 = math.exp %284 : vector<8x96xf32>
    %cst_193 = arith.constant 1.000000e+00 : f32
    %286 = vector.broadcast %cst_193 : f32 to vector<8x96xf32>
    %287 = arith.addf %286, %285 : vector<8x96xf32>
    %288 = arith.divf %286, %287 : vector<8x96xf32>
    %289 = vector.extract_strided_slice %288 {offsets = [0, 0], sizes = [8, 32], strides = [1, 1]} : vector<8x96xf32> to vector<8x32xf32>
    %290 = vector.extract_strided_slice %288 {offsets = [0, 32], sizes = [8, 32], strides = [1, 1]} : vector<8x96xf32> to vector<8x32xf32>
    %291 = vector.extract_strided_slice %288 {offsets = [0, 64], sizes = [8, 32], strides = [1, 1]} : vector<8x96xf32> to vector<8x32xf32>
    %292 = vector.extract_strided_slice %280 {offsets = [0, 96], sizes = [8, 32], strides = [1, 1]} : vector<8x128xf32> to vector<8x32xf32>
    %293 = math.tanh %292 : vector<8x32xf32>
    %294 = arith.mulf %290, %282 : vector<8x32xf32>
    %295 = arith.mulf %289, %293 : vector<8x32xf32>
    %296 = arith.addf %294, %295 : vector<8x32xf32>
    %297 = math.tanh %296 : vector<8x32xf32>
    %298 = arith.mulf %291, %297 : vector<8x32xf32>
    %c0_194 = arith.constant 0 : index
    %c0_195 = arith.constant 0 : index
    %c0_196 = arith.constant 0 : index
    %299 = vector.load %arg12[%c0_194, %c0_195, %c0_196] : memref<2x8x32xf32, #tpu.memory_space<vmem>>, vector<1x8x32xf32>
    %300 = vector.shape_cast %299 : vector<1x8x32xf32> to vector<8x32xf32>
    %301 = vector.shape_cast %298 : vector<8x32xf32> to vector<1x8x32xf32>
    tpu.vector_store %arg12[%c0_194, %c0_195, %c0_196], %301 {strides = array<i32>} : memref<2x8x32xf32, #tpu.memory_space<vmem>>, vector<1x8x32xf32>,
    %c0_197 = arith.constant 0 : index
    %c0_198 = arith.constant 0 : index
    %c0_199 = arith.constant 0 : index
    %302 = vector.load %arg13[%c0_197, %c0_198, %c0_199] : memref<2x8x32xf32, #tpu.memory_space<vmem>>, vector<1x8x32xf32>
    %303 = vector.shape_cast %302 : vector<1x8x32xf32> to vector<8x32xf32>
    %304 = vector.shape_cast %296 : vector<8x32xf32> to vector<1x8x32xf32>
    tpu.vector_store %arg13[%c0_197, %c0_198, %c0_199], %304 {strides = array<i32>} : memref<2x8x32xf32, #tpu.memory_space<vmem>>, vector<1x8x32xf32>,
    %c1_200 = arith.constant 1 : index
    %c0_201 = arith.constant 0 : index
    %c0_202 = arith.constant 0 : index
    %305 = vector.load %arg12[%c1_200, %c0_201, %c0_202] : memref<2x8x32xf32, #tpu.memory_space<vmem>>, vector<1x8x32xf32>
    %306 = vector.shape_cast %305 : vector<1x8x32xf32> to vector<8x32xf32>
    %c0_203 = arith.constant 0 : index
    %c0_204 = arith.constant 0 : index
    %c0_205 = arith.constant 0 : index
    %307 = vector.load %arg12[%c0_203, %c0_204, %c0_205] : memref<2x8x32xf32, #tpu.memory_space<vmem>>, vector<1x8x32xf32>
    %308 = vector.shape_cast %307 : vector<1x8x32xf32> to vector<8x32xf32>
    %c0_206 = arith.constant 0 : index
    %c0_207 = arith.constant 0 : index
    %309 = vector.load %arg6[%c0_206, %c0_207] : memref<32x128xf32, #tpu.memory_space<vmem>>, vector<32x128xf32>
    %cst_208 = arith.constant dense<0.000000e+00> : vector<8x128xf32>
    %310 = tpu.matmul %308, %309, %cst_208 {dimension_numbers = #tpu.dot_dimension_numbers<[1], [0], [0], [1], [0, 0, 1, 1], [], []>} : vector<8x32xf32>, vector<32x128xf32>, vector<8x128xf32> -> vector<8x128xf32>
    %c0_209 = arith.constant 0 : index
    %c0_210 = arith.constant 0 : index
    %311 = vector.load %arg7[%c0_209, %c0_210] : memref<32x128xf32, #tpu.memory_space<vmem>>, vector<32x128xf32>
    %cst_211 = arith.constant dense<0.000000e+00> : vector<8x128xf32>
    %312 = tpu.matmul %306, %311, %cst_211 {dimension_numbers = #tpu.dot_dimension_numbers<[1], [0], [0], [1], [0, 0, 1, 1], [], []>} : vector<8x32xf32>, vector<32x128xf32>, vector<8x128xf32> -> vector<8x128xf32>
    %313 = arith.addf %310, %312 : vector<8x128xf32>
    %c0_212 = arith.constant 0 : index
    %c0_213 = arith.constant 0 : index
    %314 = vector.load %arg8[%c0_212, %c0_213] : memref<1x128xf32, #tpu.memory_space<vmem>>, vector<1x128xf32>
    %315 = vector.broadcast %314 : vector<1x128xf32> to vector<8x128xf32>
    %316 = arith.addf %313, %315 : vector<8x128xf32>
    %c1_214 = arith.constant 1 : index
    %c0_215 = arith.constant 0 : index
    %c0_216 = arith.constant 0 : index
    %317 = vector.load %arg13[%c1_214, %c0_215, %c0_216] : memref<2x8x32xf32, #tpu.memory_space<vmem>>, vector<1x8x32xf32>
    %318 = vector.shape_cast %317 : vector<1x8x32xf32> to vector<8x32xf32>
    %319 = vector.extract_strided_slice %316 {offsets = [0, 0], sizes = [8, 96], strides = [1, 1]} : vector<8x128xf32> to vector<8x96xf32>
    %320 = arith.negf %319 : vector<8x96xf32>
    %321 = math.exp %320 : vector<8x96xf32>
    %cst_217 = arith.constant 1.000000e+00 : f32
    %322 = vector.broadcast %cst_217 : f32 to vector<8x96xf32>
    %323 = arith.addf %322, %321 : vector<8x96xf32>
    %324 = arith.divf %322, %323 : vector<8x96xf32>
    %325 = vector.extract_strided_slice %324 {offsets = [0, 0], sizes = [8, 32], strides = [1, 1]} : vector<8x96xf32> to vector<8x32xf32>
    %326 = vector.extract_strided_slice %324 {offsets = [0, 32], sizes = [8, 32], strides = [1, 1]} : vector<8x96xf32> to vector<8x32xf32>
    %327 = vector.extract_strided_slice %324 {offsets = [0, 64], sizes = [8, 32], strides = [1, 1]} : vector<8x96xf32> to vector<8x32xf32>
    %328 = vector.extract_strided_slice %316 {offsets = [0, 96], sizes = [8, 32], strides = [1, 1]} : vector<8x128xf32> to vector<8x32xf32>
    %329 = math.tanh %328 : vector<8x32xf32>
    %330 = arith.mulf %326, %318 : vector<8x32xf32>
    %331 = arith.mulf %325, %329 : vector<8x32xf32>
    %332 = arith.addf %330, %331 : vector<8x32xf32>
    %333 = math.tanh %332 : vector<8x32xf32>
    %334 = arith.mulf %327, %333 : vector<8x32xf32>
    %c1_218 = arith.constant 1 : index
    %c0_219 = arith.constant 0 : index
    %c0_220 = arith.constant 0 : index
    %335 = vector.load %arg12[%c1_218, %c0_219, %c0_220] : memref<2x8x32xf32, #tpu.memory_space<vmem>>, vector<1x8x32xf32>
    %336 = vector.shape_cast %335 : vector<1x8x32xf32> to vector<8x32xf32>
    %337 = vector.shape_cast %334 : vector<8x32xf32> to vector<1x8x32xf32>
    tpu.vector_store %arg12[%c1_218, %c0_219, %c0_220], %337 {strides = array<i32>} : memref<2x8x32xf32, #tpu.memory_space<vmem>>, vector<1x8x32xf32>,
    %c1_221 = arith.constant 1 : index
    %c0_222 = arith.constant 0 : index
    %c0_223 = arith.constant 0 : index
    %338 = vector.load %arg13[%c1_221, %c0_222, %c0_223] : memref<2x8x32xf32, #tpu.memory_space<vmem>>, vector<1x8x32xf32>
    %339 = vector.shape_cast %338 : vector<1x8x32xf32> to vector<8x32xf32>
    %340 = vector.shape_cast %332 : vector<8x32xf32> to vector<1x8x32xf32>
    tpu.vector_store %arg13[%c1_221, %c0_222, %c0_223], %340 {strides = array<i32>} : memref<2x8x32xf32, #tpu.memory_space<vmem>>, vector<1x8x32xf32>,
    %c0_224 = arith.constant 0 : index
    %c0_225 = arith.constant 0 : index
    %c0_226 = arith.constant 0 : index
    %341 = vector.load %arg12[%c0_224, %c0_225, %c0_226] : memref<2x8x32xf32, #tpu.memory_space<vmem>>, vector<1x8x32xf32>
    %342 = vector.shape_cast %341 : vector<1x8x32xf32> to vector<8x32xf32>
    %c40 = arith.constant 40 : index
    %c0_227 = arith.constant 0 : index
    %343 = vector.load %arg14[%c40, %c0_227] : memref<64x128xf32, #tpu.memory_space<vmem>>, vector<8x128xf32>
    %c0_228 = arith.constant 0 : index
    %c0_229 = arith.constant 0 : index
    %344 = vector.load %arg4[%c0_228, %c0_229] : memref<32x128xf32, #tpu.memory_space<vmem>>, vector<32x128xf32>
    %cst_230 = arith.constant dense<0.000000e+00> : vector<8x128xf32>
    %345 = tpu.matmul %342, %344, %cst_230 {dimension_numbers = #tpu.dot_dimension_numbers<[1], [0], [0], [1], [0, 0, 1, 1], [], []>} : vector<8x32xf32>, vector<32x128xf32>, vector<8x128xf32> -> vector<8x128xf32>
    %346 = arith.addf %343, %345 : vector<8x128xf32>
    %c0_231 = arith.constant 0 : index
    %c0_232 = arith.constant 0 : index
    %c0_233 = arith.constant 0 : index
    %347 = vector.load %arg13[%c0_231, %c0_232, %c0_233] : memref<2x8x32xf32, #tpu.memory_space<vmem>>, vector<1x8x32xf32>
    %348 = vector.shape_cast %347 : vector<1x8x32xf32> to vector<8x32xf32>
    %349 = vector.extract_strided_slice %346 {offsets = [0, 0], sizes = [8, 96], strides = [1, 1]} : vector<8x128xf32> to vector<8x96xf32>
    %350 = arith.negf %349 : vector<8x96xf32>
    %351 = math.exp %350 : vector<8x96xf32>
    %cst_234 = arith.constant 1.000000e+00 : f32
    %352 = vector.broadcast %cst_234 : f32 to vector<8x96xf32>
    %353 = arith.addf %352, %351 : vector<8x96xf32>
    %354 = arith.divf %352, %353 : vector<8x96xf32>
    %355 = vector.extract_strided_slice %354 {offsets = [0, 0], sizes = [8, 32], strides = [1, 1]} : vector<8x96xf32> to vector<8x32xf32>
    %356 = vector.extract_strided_slice %354 {offsets = [0, 32], sizes = [8, 32], strides = [1, 1]} : vector<8x96xf32> to vector<8x32xf32>
    %357 = vector.extract_strided_slice %354 {offsets = [0, 64], sizes = [8, 32], strides = [1, 1]} : vector<8x96xf32> to vector<8x32xf32>
    %358 = vector.extract_strided_slice %346 {offsets = [0, 96], sizes = [8, 32], strides = [1, 1]} : vector<8x128xf32> to vector<8x32xf32>
    %359 = math.tanh %358 : vector<8x32xf32>
    %360 = arith.mulf %356, %348 : vector<8x32xf32>
    %361 = arith.mulf %355, %359 : vector<8x32xf32>
    %362 = arith.addf %360, %361 : vector<8x32xf32>
    %363 = math.tanh %362 : vector<8x32xf32>
    %364 = arith.mulf %357, %363 : vector<8x32xf32>
    %c0_235 = arith.constant 0 : index
    %c0_236 = arith.constant 0 : index
    %c0_237 = arith.constant 0 : index
    %365 = vector.load %arg12[%c0_235, %c0_236, %c0_237] : memref<2x8x32xf32, #tpu.memory_space<vmem>>, vector<1x8x32xf32>
    %366 = vector.shape_cast %365 : vector<1x8x32xf32> to vector<8x32xf32>
    %367 = vector.shape_cast %364 : vector<8x32xf32> to vector<1x8x32xf32>
    tpu.vector_store %arg12[%c0_235, %c0_236, %c0_237], %367 {strides = array<i32>} : memref<2x8x32xf32, #tpu.memory_space<vmem>>, vector<1x8x32xf32>,
    %c0_238 = arith.constant 0 : index
    %c0_239 = arith.constant 0 : index
    %c0_240 = arith.constant 0 : index
    %368 = vector.load %arg13[%c0_238, %c0_239, %c0_240] : memref<2x8x32xf32, #tpu.memory_space<vmem>>, vector<1x8x32xf32>
    %369 = vector.shape_cast %368 : vector<1x8x32xf32> to vector<8x32xf32>
    %370 = vector.shape_cast %362 : vector<8x32xf32> to vector<1x8x32xf32>
    tpu.vector_store %arg13[%c0_238, %c0_239, %c0_240], %370 {strides = array<i32>} : memref<2x8x32xf32, #tpu.memory_space<vmem>>, vector<1x8x32xf32>,
    %c1_241 = arith.constant 1 : index
    %c0_242 = arith.constant 0 : index
    %c0_243 = arith.constant 0 : index
    %371 = vector.load %arg12[%c1_241, %c0_242, %c0_243] : memref<2x8x32xf32, #tpu.memory_space<vmem>>, vector<1x8x32xf32>
    %372 = vector.shape_cast %371 : vector<1x8x32xf32> to vector<8x32xf32>
    %c0_244 = arith.constant 0 : index
    %c0_245 = arith.constant 0 : index
    %c0_246 = arith.constant 0 : index
    %373 = vector.load %arg12[%c0_244, %c0_245, %c0_246] : memref<2x8x32xf32, #tpu.memory_space<vmem>>, vector<1x8x32xf32>
    %374 = vector.shape_cast %373 : vector<1x8x32xf32> to vector<8x32xf32>
    %c0_247 = arith.constant 0 : index
    %c0_248 = arith.constant 0 : index
    %375 = vector.load %arg6[%c0_247, %c0_248] : memref<32x128xf32, #tpu.memory_space<vmem>>, vector<32x128xf32>
    %cst_249 = arith.constant dense<0.000000e+00> : vector<8x128xf32>
    %376 = tpu.matmul %374, %375, %cst_249 {dimension_numbers = #tpu.dot_dimension_numbers<[1], [0], [0], [1], [0, 0, 1, 1], [], []>} : vector<8x32xf32>, vector<32x128xf32>, vector<8x128xf32> -> vector<8x128xf32>
    %c0_250 = arith.constant 0 : index
    %c0_251 = arith.constant 0 : index
    %377 = vector.load %arg7[%c0_250, %c0_251] : memref<32x128xf32, #tpu.memory_space<vmem>>, vector<32x128xf32>
    %cst_252 = arith.constant dense<0.000000e+00> : vector<8x128xf32>
    %378 = tpu.matmul %372, %377, %cst_252 {dimension_numbers = #tpu.dot_dimension_numbers<[1], [0], [0], [1], [0, 0, 1, 1], [], []>} : vector<8x32xf32>, vector<32x128xf32>, vector<8x128xf32> -> vector<8x128xf32>
    %379 = arith.addf %376, %378 : vector<8x128xf32>
    %c0_253 = arith.constant 0 : index
    %c0_254 = arith.constant 0 : index
    %380 = vector.load %arg8[%c0_253, %c0_254] : memref<1x128xf32, #tpu.memory_space<vmem>>, vector<1x128xf32>
    %381 = vector.broadcast %380 : vector<1x128xf32> to vector<8x128xf32>
    %382 = arith.addf %379, %381 : vector<8x128xf32>
    %c1_255 = arith.constant 1 : index
    %c0_256 = arith.constant 0 : index
    %c0_257 = arith.constant 0 : index
    %383 = vector.load %arg13[%c1_255, %c0_256, %c0_257] : memref<2x8x32xf32, #tpu.memory_space<vmem>>, vector<1x8x32xf32>
    %384 = vector.shape_cast %383 : vector<1x8x32xf32> to vector<8x32xf32>
    %385 = vector.extract_strided_slice %382 {offsets = [0, 0], sizes = [8, 96], strides = [1, 1]} : vector<8x128xf32> to vector<8x96xf32>
    %386 = arith.negf %385 : vector<8x96xf32>
    %387 = math.exp %386 : vector<8x96xf32>
    %cst_258 = arith.constant 1.000000e+00 : f32
    %388 = vector.broadcast %cst_258 : f32 to vector<8x96xf32>
    %389 = arith.addf %388, %387 : vector<8x96xf32>
    %390 = arith.divf %388, %389 : vector<8x96xf32>
    %391 = vector.extract_strided_slice %390 {offsets = [0, 0], sizes = [8, 32], strides = [1, 1]} : vector<8x96xf32> to vector<8x32xf32>
    %392 = vector.extract_strided_slice %390 {offsets = [0, 32], sizes = [8, 32], strides = [1, 1]} : vector<8x96xf32> to vector<8x32xf32>
    %393 = vector.extract_strided_slice %390 {offsets = [0, 64], sizes = [8, 32], strides = [1, 1]} : vector<8x96xf32> to vector<8x32xf32>
    %394 = vector.extract_strided_slice %382 {offsets = [0, 96], sizes = [8, 32], strides = [1, 1]} : vector<8x128xf32> to vector<8x32xf32>
    %395 = math.tanh %394 : vector<8x32xf32>
    %396 = arith.mulf %392, %384 : vector<8x32xf32>
    %397 = arith.mulf %391, %395 : vector<8x32xf32>
    %398 = arith.addf %396, %397 : vector<8x32xf32>
    %399 = math.tanh %398 : vector<8x32xf32>
    %400 = arith.mulf %393, %399 : vector<8x32xf32>
    %c1_259 = arith.constant 1 : index
    %c0_260 = arith.constant 0 : index
    %c0_261 = arith.constant 0 : index
    %401 = vector.load %arg12[%c1_259, %c0_260, %c0_261] : memref<2x8x32xf32, #tpu.memory_space<vmem>>, vector<1x8x32xf32>
    %402 = vector.shape_cast %401 : vector<1x8x32xf32> to vector<8x32xf32>
    %403 = vector.shape_cast %400 : vector<8x32xf32> to vector<1x8x32xf32>
    tpu.vector_store %arg12[%c1_259, %c0_260, %c0_261], %403 {strides = array<i32>} : memref<2x8x32xf32, #tpu.memory_space<vmem>>, vector<1x8x32xf32>,
    %c1_262 = arith.constant 1 : index
    %c0_263 = arith.constant 0 : index
    %c0_264 = arith.constant 0 : index
    %404 = vector.load %arg13[%c1_262, %c0_263, %c0_264] : memref<2x8x32xf32, #tpu.memory_space<vmem>>, vector<1x8x32xf32>
    %405 = vector.shape_cast %404 : vector<1x8x32xf32> to vector<8x32xf32>
    %406 = vector.shape_cast %398 : vector<8x32xf32> to vector<1x8x32xf32>
    tpu.vector_store %arg13[%c1_262, %c0_263, %c0_264], %406 {strides = array<i32>} : memref<2x8x32xf32, #tpu.memory_space<vmem>>, vector<1x8x32xf32>,
    %c0_265 = arith.constant 0 : index
    %c0_266 = arith.constant 0 : index
    %c0_267 = arith.constant 0 : index
    %407 = vector.load %arg12[%c0_265, %c0_266, %c0_267] : memref<2x8x32xf32, #tpu.memory_space<vmem>>, vector<1x8x32xf32>
    %408 = vector.shape_cast %407 : vector<1x8x32xf32> to vector<8x32xf32>
    %c48 = arith.constant 48 : index
    %c0_268 = arith.constant 0 : index
    %409 = vector.load %arg14[%c48, %c0_268] : memref<64x128xf32, #tpu.memory_space<vmem>>, vector<8x128xf32>
    %c0_269 = arith.constant 0 : index
    %c0_270 = arith.constant 0 : index
    %410 = vector.load %arg4[%c0_269, %c0_270] : memref<32x128xf32, #tpu.memory_space<vmem>>, vector<32x128xf32>
    %cst_271 = arith.constant dense<0.000000e+00> : vector<8x128xf32>
    %411 = tpu.matmul %408, %410, %cst_271 {dimension_numbers = #tpu.dot_dimension_numbers<[1], [0], [0], [1], [0, 0, 1, 1], [], []>} : vector<8x32xf32>, vector<32x128xf32>, vector<8x128xf32> -> vector<8x128xf32>
    %412 = arith.addf %409, %411 : vector<8x128xf32>
    %c0_272 = arith.constant 0 : index
    %c0_273 = arith.constant 0 : index
    %c0_274 = arith.constant 0 : index
    %413 = vector.load %arg13[%c0_272, %c0_273, %c0_274] : memref<2x8x32xf32, #tpu.memory_space<vmem>>, vector<1x8x32xf32>
    %414 = vector.shape_cast %413 : vector<1x8x32xf32> to vector<8x32xf32>
    %415 = vector.extract_strided_slice %412 {offsets = [0, 0], sizes = [8, 96], strides = [1, 1]} : vector<8x128xf32> to vector<8x96xf32>
    %416 = arith.negf %415 : vector<8x96xf32>
    %417 = math.exp %416 : vector<8x96xf32>
    %cst_275 = arith.constant 1.000000e+00 : f32
    %418 = vector.broadcast %cst_275 : f32 to vector<8x96xf32>
    %419 = arith.addf %418, %417 : vector<8x96xf32>
    %420 = arith.divf %418, %419 : vector<8x96xf32>
    %421 = vector.extract_strided_slice %420 {offsets = [0, 0], sizes = [8, 32], strides = [1, 1]} : vector<8x96xf32> to vector<8x32xf32>
    %422 = vector.extract_strided_slice %420 {offsets = [0, 32], sizes = [8, 32], strides = [1, 1]} : vector<8x96xf32> to vector<8x32xf32>
    %423 = vector.extract_strided_slice %420 {offsets = [0, 64], sizes = [8, 32], strides = [1, 1]} : vector<8x96xf32> to vector<8x32xf32>
    %424 = vector.extract_strided_slice %412 {offsets = [0, 96], sizes = [8, 32], strides = [1, 1]} : vector<8x128xf32> to vector<8x32xf32>
    %425 = math.tanh %424 : vector<8x32xf32>
    %426 = arith.mulf %422, %414 : vector<8x32xf32>
    %427 = arith.mulf %421, %425 : vector<8x32xf32>
    %428 = arith.addf %426, %427 : vector<8x32xf32>
    %429 = math.tanh %428 : vector<8x32xf32>
    %430 = arith.mulf %423, %429 : vector<8x32xf32>
    %c0_276 = arith.constant 0 : index
    %c0_277 = arith.constant 0 : index
    %c0_278 = arith.constant 0 : index
    %431 = vector.load %arg12[%c0_276, %c0_277, %c0_278] : memref<2x8x32xf32, #tpu.memory_space<vmem>>, vector<1x8x32xf32>
    %432 = vector.shape_cast %431 : vector<1x8x32xf32> to vector<8x32xf32>
    %433 = vector.shape_cast %430 : vector<8x32xf32> to vector<1x8x32xf32>
    tpu.vector_store %arg12[%c0_276, %c0_277, %c0_278], %433 {strides = array<i32>} : memref<2x8x32xf32, #tpu.memory_space<vmem>>, vector<1x8x32xf32>,
    %c0_279 = arith.constant 0 : index
    %c0_280 = arith.constant 0 : index
    %c0_281 = arith.constant 0 : index
    %434 = vector.load %arg13[%c0_279, %c0_280, %c0_281] : memref<2x8x32xf32, #tpu.memory_space<vmem>>, vector<1x8x32xf32>
    %435 = vector.shape_cast %434 : vector<1x8x32xf32> to vector<8x32xf32>
    %436 = vector.shape_cast %428 : vector<8x32xf32> to vector<1x8x32xf32>
    tpu.vector_store %arg13[%c0_279, %c0_280, %c0_281], %436 {strides = array<i32>} : memref<2x8x32xf32, #tpu.memory_space<vmem>>, vector<1x8x32xf32>,
    %c1_282 = arith.constant 1 : index
    %c0_283 = arith.constant 0 : index
    %c0_284 = arith.constant 0 : index
    %437 = vector.load %arg12[%c1_282, %c0_283, %c0_284] : memref<2x8x32xf32, #tpu.memory_space<vmem>>, vector<1x8x32xf32>
    %438 = vector.shape_cast %437 : vector<1x8x32xf32> to vector<8x32xf32>
    %c0_285 = arith.constant 0 : index
    %c0_286 = arith.constant 0 : index
    %c0_287 = arith.constant 0 : index
    %439 = vector.load %arg12[%c0_285, %c0_286, %c0_287] : memref<2x8x32xf32, #tpu.memory_space<vmem>>, vector<1x8x32xf32>
    %440 = vector.shape_cast %439 : vector<1x8x32xf32> to vector<8x32xf32>
    %c0_288 = arith.constant 0 : index
    %c0_289 = arith.constant 0 : index
    %441 = vector.load %arg6[%c0_288, %c0_289] : memref<32x128xf32, #tpu.memory_space<vmem>>, vector<32x128xf32>
    %cst_290 = arith.constant dense<0.000000e+00> : vector<8x128xf32>
    %442 = tpu.matmul %440, %441, %cst_290 {dimension_numbers = #tpu.dot_dimension_numbers<[1], [0], [0], [1], [0, 0, 1, 1], [], []>} : vector<8x32xf32>, vector<32x128xf32>, vector<8x128xf32> -> vector<8x128xf32>
    %c0_291 = arith.constant 0 : index
    %c0_292 = arith.constant 0 : index
    %443 = vector.load %arg7[%c0_291, %c0_292] : memref<32x128xf32, #tpu.memory_space<vmem>>, vector<32x128xf32>
    %cst_293 = arith.constant dense<0.000000e+00> : vector<8x128xf32>
    %444 = tpu.matmul %438, %443, %cst_293 {dimension_numbers = #tpu.dot_dimension_numbers<[1], [0], [0], [1], [0, 0, 1, 1], [], []>} : vector<8x32xf32>, vector<32x128xf32>, vector<8x128xf32> -> vector<8x128xf32>
    %445 = arith.addf %442, %444 : vector<8x128xf32>
    %c0_294 = arith.constant 0 : index
    %c0_295 = arith.constant 0 : index
    %446 = vector.load %arg8[%c0_294, %c0_295] : memref<1x128xf32, #tpu.memory_space<vmem>>, vector<1x128xf32>
    %447 = vector.broadcast %446 : vector<1x128xf32> to vector<8x128xf32>
    %448 = arith.addf %445, %447 : vector<8x128xf32>
    %c1_296 = arith.constant 1 : index
    %c0_297 = arith.constant 0 : index
    %c0_298 = arith.constant 0 : index
    %449 = vector.load %arg13[%c1_296, %c0_297, %c0_298] : memref<2x8x32xf32, #tpu.memory_space<vmem>>, vector<1x8x32xf32>
    %450 = vector.shape_cast %449 : vector<1x8x32xf32> to vector<8x32xf32>
    %451 = vector.extract_strided_slice %448 {offsets = [0, 0], sizes = [8, 96], strides = [1, 1]} : vector<8x128xf32> to vector<8x96xf32>
    %452 = arith.negf %451 : vector<8x96xf32>
    %453 = math.exp %452 : vector<8x96xf32>
    %cst_299 = arith.constant 1.000000e+00 : f32
    %454 = vector.broadcast %cst_299 : f32 to vector<8x96xf32>
    %455 = arith.addf %454, %453 : vector<8x96xf32>
    %456 = arith.divf %454, %455 : vector<8x96xf32>
    %457 = vector.extract_strided_slice %456 {offsets = [0, 0], sizes = [8, 32], strides = [1, 1]} : vector<8x96xf32> to vector<8x32xf32>
    %458 = vector.extract_strided_slice %456 {offsets = [0, 32], sizes = [8, 32], strides = [1, 1]} : vector<8x96xf32> to vector<8x32xf32>
    %459 = vector.extract_strided_slice %456 {offsets = [0, 64], sizes = [8, 32], strides = [1, 1]} : vector<8x96xf32> to vector<8x32xf32>
    %460 = vector.extract_strided_slice %448 {offsets = [0, 96], sizes = [8, 32], strides = [1, 1]} : vector<8x128xf32> to vector<8x32xf32>
    %461 = math.tanh %460 : vector<8x32xf32>
    %462 = arith.mulf %458, %450 : vector<8x32xf32>
    %463 = arith.mulf %457, %461 : vector<8x32xf32>
    %464 = arith.addf %462, %463 : vector<8x32xf32>
    %465 = math.tanh %464 : vector<8x32xf32>
    %466 = arith.mulf %459, %465 : vector<8x32xf32>
    %c1_300 = arith.constant 1 : index
    %c0_301 = arith.constant 0 : index
    %c0_302 = arith.constant 0 : index
    %467 = vector.load %arg12[%c1_300, %c0_301, %c0_302] : memref<2x8x32xf32, #tpu.memory_space<vmem>>, vector<1x8x32xf32>
    %468 = vector.shape_cast %467 : vector<1x8x32xf32> to vector<8x32xf32>
    %469 = vector.shape_cast %466 : vector<8x32xf32> to vector<1x8x32xf32>
    tpu.vector_store %arg12[%c1_300, %c0_301, %c0_302], %469 {strides = array<i32>} : memref<2x8x32xf32, #tpu.memory_space<vmem>>, vector<1x8x32xf32>,
    %c1_303 = arith.constant 1 : index
    %c0_304 = arith.constant 0 : index
    %c0_305 = arith.constant 0 : index
    %470 = vector.load %arg13[%c1_303, %c0_304, %c0_305] : memref<2x8x32xf32, #tpu.memory_space<vmem>>, vector<1x8x32xf32>
    %471 = vector.shape_cast %470 : vector<1x8x32xf32> to vector<8x32xf32>
    %472 = vector.shape_cast %464 : vector<8x32xf32> to vector<1x8x32xf32>
    tpu.vector_store %arg13[%c1_303, %c0_304, %c0_305], %472 {strides = array<i32>} : memref<2x8x32xf32, #tpu.memory_space<vmem>>, vector<1x8x32xf32>,
    %c0_306 = arith.constant 0 : index
    %c0_307 = arith.constant 0 : index
    %c0_308 = arith.constant 0 : index
    %473 = vector.load %arg12[%c0_306, %c0_307, %c0_308] : memref<2x8x32xf32, #tpu.memory_space<vmem>>, vector<1x8x32xf32>
    %474 = vector.shape_cast %473 : vector<1x8x32xf32> to vector<8x32xf32>
    %c56 = arith.constant 56 : index
    %c0_309 = arith.constant 0 : index
    %475 = vector.load %arg14[%c56, %c0_309] : memref<64x128xf32, #tpu.memory_space<vmem>>, vector<8x128xf32>
    %c0_310 = arith.constant 0 : index
    %c0_311 = arith.constant 0 : index
    %476 = vector.load %arg4[%c0_310, %c0_311] : memref<32x128xf32, #tpu.memory_space<vmem>>, vector<32x128xf32>
    %cst_312 = arith.constant dense<0.000000e+00> : vector<8x128xf32>
    %477 = tpu.matmul %474, %476, %cst_312 {dimension_numbers = #tpu.dot_dimension_numbers<[1], [0], [0], [1], [0, 0, 1, 1], [], []>} : vector<8x32xf32>, vector<32x128xf32>, vector<8x128xf32> -> vector<8x128xf32>
    %478 = arith.addf %475, %477 : vector<8x128xf32>
    %c0_313 = arith.constant 0 : index
    %c0_314 = arith.constant 0 : index
    %c0_315 = arith.constant 0 : index
    %479 = vector.load %arg13[%c0_313, %c0_314, %c0_315] : memref<2x8x32xf32, #tpu.memory_space<vmem>>, vector<1x8x32xf32>
    %480 = vector.shape_cast %479 : vector<1x8x32xf32> to vector<8x32xf32>
    %481 = vector.extract_strided_slice %478 {offsets = [0, 0], sizes = [8, 96], strides = [1, 1]} : vector<8x128xf32> to vector<8x96xf32>
    %482 = arith.negf %481 : vector<8x96xf32>
    %483 = math.exp %482 : vector<8x96xf32>
    %cst_316 = arith.constant 1.000000e+00 : f32
    %484 = vector.broadcast %cst_316 : f32 to vector<8x96xf32>
    %485 = arith.addf %484, %483 : vector<8x96xf32>
    %486 = arith.divf %484, %485 : vector<8x96xf32>
    %487 = vector.extract_strided_slice %486 {offsets = [0, 0], sizes = [8, 32], strides = [1, 1]} : vector<8x96xf32> to vector<8x32xf32>
    %488 = vector.extract_strided_slice %486 {offsets = [0, 32], sizes = [8, 32], strides = [1, 1]} : vector<8x96xf32> to vector<8x32xf32>
    %489 = vector.extract_strided_slice %486 {offsets = [0, 64], sizes = [8, 32], strides = [1, 1]} : vector<8x96xf32> to vector<8x32xf32>
    %490 = vector.extract_strided_slice %478 {offsets = [0, 96], sizes = [8, 32], strides = [1, 1]} : vector<8x128xf32> to vector<8x32xf32>
    %491 = math.tanh %490 : vector<8x32xf32>
    %492 = arith.mulf %488, %480 : vector<8x32xf32>
    %493 = arith.mulf %487, %491 : vector<8x32xf32>
    %494 = arith.addf %492, %493 : vector<8x32xf32>
    %495 = math.tanh %494 : vector<8x32xf32>
    %496 = arith.mulf %489, %495 : vector<8x32xf32>
    %c0_317 = arith.constant 0 : index
    %c0_318 = arith.constant 0 : index
    %c0_319 = arith.constant 0 : index
    %497 = vector.load %arg12[%c0_317, %c0_318, %c0_319] : memref<2x8x32xf32, #tpu.memory_space<vmem>>, vector<1x8x32xf32>
    %498 = vector.shape_cast %497 : vector<1x8x32xf32> to vector<8x32xf32>
    %499 = vector.shape_cast %496 : vector<8x32xf32> to vector<1x8x32xf32>
    tpu.vector_store %arg12[%c0_317, %c0_318, %c0_319], %499 {strides = array<i32>} : memref<2x8x32xf32, #tpu.memory_space<vmem>>, vector<1x8x32xf32>,
    %c0_320 = arith.constant 0 : index
    %c0_321 = arith.constant 0 : index
    %c0_322 = arith.constant 0 : index
    %500 = vector.load %arg13[%c0_320, %c0_321, %c0_322] : memref<2x8x32xf32, #tpu.memory_space<vmem>>, vector<1x8x32xf32>
    %501 = vector.shape_cast %500 : vector<1x8x32xf32> to vector<8x32xf32>
    %502 = vector.shape_cast %494 : vector<8x32xf32> to vector<1x8x32xf32>
    tpu.vector_store %arg13[%c0_320, %c0_321, %c0_322], %502 {strides = array<i32>} : memref<2x8x32xf32, #tpu.memory_space<vmem>>, vector<1x8x32xf32>,
    %c1_323 = arith.constant 1 : index
    %c0_324 = arith.constant 0 : index
    %c0_325 = arith.constant 0 : index
    %503 = vector.load %arg12[%c1_323, %c0_324, %c0_325] : memref<2x8x32xf32, #tpu.memory_space<vmem>>, vector<1x8x32xf32>
    %504 = vector.shape_cast %503 : vector<1x8x32xf32> to vector<8x32xf32>
    %c0_326 = arith.constant 0 : index
    %c0_327 = arith.constant 0 : index
    %c0_328 = arith.constant 0 : index
    %505 = vector.load %arg12[%c0_326, %c0_327, %c0_328] : memref<2x8x32xf32, #tpu.memory_space<vmem>>, vector<1x8x32xf32>
    %506 = vector.shape_cast %505 : vector<1x8x32xf32> to vector<8x32xf32>
    %c0_329 = arith.constant 0 : index
    %c0_330 = arith.constant 0 : index
    %507 = vector.load %arg6[%c0_329, %c0_330] : memref<32x128xf32, #tpu.memory_space<vmem>>, vector<32x128xf32>
    %cst_331 = arith.constant dense<0.000000e+00> : vector<8x128xf32>
    %508 = tpu.matmul %506, %507, %cst_331 {dimension_numbers = #tpu.dot_dimension_numbers<[1], [0], [0], [1], [0, 0, 1, 1], [], []>} : vector<8x32xf32>, vector<32x128xf32>, vector<8x128xf32> -> vector<8x128xf32>
    %c0_332 = arith.constant 0 : index
    %c0_333 = arith.constant 0 : index
    %509 = vector.load %arg7[%c0_332, %c0_333] : memref<32x128xf32, #tpu.memory_space<vmem>>, vector<32x128xf32>
    %cst_334 = arith.constant dense<0.000000e+00> : vector<8x128xf32>
    %510 = tpu.matmul %504, %509, %cst_334 {dimension_numbers = #tpu.dot_dimension_numbers<[1], [0], [0], [1], [0, 0, 1, 1], [], []>} : vector<8x32xf32>, vector<32x128xf32>, vector<8x128xf32> -> vector<8x128xf32>
    %511 = arith.addf %508, %510 : vector<8x128xf32>
    %c0_335 = arith.constant 0 : index
    %c0_336 = arith.constant 0 : index
    %512 = vector.load %arg8[%c0_335, %c0_336] : memref<1x128xf32, #tpu.memory_space<vmem>>, vector<1x128xf32>
    %513 = vector.broadcast %512 : vector<1x128xf32> to vector<8x128xf32>
    %514 = arith.addf %511, %513 : vector<8x128xf32>
    %c1_337 = arith.constant 1 : index
    %c0_338 = arith.constant 0 : index
    %c0_339 = arith.constant 0 : index
    %515 = vector.load %arg13[%c1_337, %c0_338, %c0_339] : memref<2x8x32xf32, #tpu.memory_space<vmem>>, vector<1x8x32xf32>
    %516 = vector.shape_cast %515 : vector<1x8x32xf32> to vector<8x32xf32>
    %517 = vector.extract_strided_slice %514 {offsets = [0, 0], sizes = [8, 96], strides = [1, 1]} : vector<8x128xf32> to vector<8x96xf32>
    %518 = arith.negf %517 : vector<8x96xf32>
    %519 = math.exp %518 : vector<8x96xf32>
    %cst_340 = arith.constant 1.000000e+00 : f32
    %520 = vector.broadcast %cst_340 : f32 to vector<8x96xf32>
    %521 = arith.addf %520, %519 : vector<8x96xf32>
    %522 = arith.divf %520, %521 : vector<8x96xf32>
    %523 = vector.extract_strided_slice %522 {offsets = [0, 0], sizes = [8, 32], strides = [1, 1]} : vector<8x96xf32> to vector<8x32xf32>
    %524 = vector.extract_strided_slice %522 {offsets = [0, 32], sizes = [8, 32], strides = [1, 1]} : vector<8x96xf32> to vector<8x32xf32>
    %525 = vector.extract_strided_slice %522 {offsets = [0, 64], sizes = [8, 32], strides = [1, 1]} : vector<8x96xf32> to vector<8x32xf32>
    %526 = vector.extract_strided_slice %514 {offsets = [0, 96], sizes = [8, 32], strides = [1, 1]} : vector<8x128xf32> to vector<8x32xf32>
    %527 = math.tanh %526 : vector<8x32xf32>
    %528 = arith.mulf %524, %516 : vector<8x32xf32>
    %529 = arith.mulf %523, %527 : vector<8x32xf32>
    %530 = arith.addf %528, %529 : vector<8x32xf32>
    %531 = math.tanh %530 : vector<8x32xf32>
    %532 = arith.mulf %525, %531 : vector<8x32xf32>
    %c1_341 = arith.constant 1 : index
    %c0_342 = arith.constant 0 : index
    %c0_343 = arith.constant 0 : index
    %533 = vector.load %arg12[%c1_341, %c0_342, %c0_343] : memref<2x8x32xf32, #tpu.memory_space<vmem>>, vector<1x8x32xf32>
    %534 = vector.shape_cast %533 : vector<1x8x32xf32> to vector<8x32xf32>
    %535 = vector.shape_cast %532 : vector<8x32xf32> to vector<1x8x32xf32>
    tpu.vector_store %arg12[%c1_341, %c0_342, %c0_343], %535 {strides = array<i32>} : memref<2x8x32xf32, #tpu.memory_space<vmem>>, vector<1x8x32xf32>,
    %c1_344 = arith.constant 1 : index
    %c0_345 = arith.constant 0 : index
    %c0_346 = arith.constant 0 : index
    %536 = vector.load %arg13[%c1_344, %c0_345, %c0_346] : memref<2x8x32xf32, #tpu.memory_space<vmem>>, vector<1x8x32xf32>
    %537 = vector.shape_cast %536 : vector<1x8x32xf32> to vector<8x32xf32>
    %538 = vector.shape_cast %530 : vector<8x32xf32> to vector<1x8x32xf32>
    tpu.vector_store %arg13[%c1_344, %c0_345, %c0_346], %538 {strides = array<i32>} : memref<2x8x32xf32, #tpu.memory_space<vmem>>, vector<1x8x32xf32>,
    %c1_347 = arith.constant 1 : index
    %c0_348 = arith.constant 0 : index
    %c0_349 = arith.constant 0 : index
    %539 = vector.load %arg12[%c1_347, %c0_348, %c0_349] : memref<2x8x32xf32, #tpu.memory_space<vmem>>, vector<1x8x32xf32>
    %540 = vector.shape_cast %539 : vector<1x8x32xf32> to vector<8x32xf32>
    %c0_350 = arith.constant 0 : index
    %c0_351 = arith.constant 0 : index
    %541 = vector.load %arg9[%c0_350, %c0_351] : memref<32x4xf32, #tpu.memory_space<vmem>>, vector<32x4xf32>
    %cst_352 = arith.constant dense<0.000000e+00> : vector<8x4xf32>
    %542 = tpu.matmul %540, %541, %cst_352 {dimension_numbers = #tpu.dot_dimension_numbers<[1], [0], [0], [1], [0, 0, 1, 1], [], []>} : vector<8x32xf32>, vector<32x4xf32>, vector<8x4xf32> -> vector<8x4xf32>
    %c0_353 = arith.constant 0 : index
    %c0_354 = arith.constant 0 : index
    %543 = vector.load %arg10[%c0_353, %c0_354] : memref<1x4xf32, #tpu.memory_space<vmem>>, vector<1x4xf32>
    %544 = vector.broadcast %543 : vector<1x4xf32> to vector<8x4xf32>
    %545 = arith.addf %542, %544 : vector<8x4xf32>
    %c0_355 = arith.constant 0 : index
    %c0_356 = arith.constant 0 : index
    %546 = vector.load %arg11[%c0_355, %c0_356] : memref<8x4xf32, #tpu.memory_space<vmem>>, vector<8x4xf32>
    tpu.vector_store %arg11[%c0_355, %c0_356], %545 {strides = array<i32>} : memref<8x4xf32, #tpu.memory_space<vmem>>, vector<8x4xf32>,
    return
  }
}

</mosaic_0001>

<bundles_post_ra>
// kernel: lstm_forward.1
= control target key start
LH: loop header
LB: loop body
LE: loop exit
PB: predicated region body
PF: predicated region fallthrough
CT: control target
= control target key end

     0   :  { %vm67_vm0 = vcmask 130048   ;;  %v3689_v0 = vmov 0.0|0.0   ;;  %vm3690_vm1 = vmmov 0   ;;  %v3691_v4 = vmov 0.0   ;;  %s3692_s20 = smov 32   ;;  %s3693_s25 = smov 96   ;;  %s4501_s3 = inlined_call_operand.vmem [shape: f32[16,128], index: 3, kind: input, shape index: {}]   ;;  %s4502_s4 = inlined_call_operand.vmem [shape: f32[32,128], index: 4, kind: input, shape index: {}]   ;;  %s4503_s0 = inlined_call_operand.vmem [shape: f32[64,16], index: 0, kind: input, shape index: {}]   ;;  %s4504_s1 = inlined_call_operand.vmem [shape: f32[2,8,32], index: 1, kind: input, shape index: {}]   ;;  %s4505_s12 = inlined_call_operand.vmem [shape: f32[2,8,32], index: 12, kind: output, shape index: {1}]   ;;  %s4506_s2 = inlined_call_operand.vmem [shape: f32[2,8,32], index: 2, kind: input, shape index: {}]   ;;  %s4507_s13 = inlined_call_operand.vmem [shape: f32[2,8,32], index: 13, kind: output, shape index: {2}]   ;;  %s4508_s5 = inlined_call_operand.vmem [shape: f32[1,128], index: 5, kind: input, shape index: {}]   ;;  %s4509_s6 = inlined_call_operand.vmem [shape: f32[32,128], index: 6, kind: input, shape index: {}]   ;;  %s4510_s7 = inlined_call_operand.vmem [shape: f32[32,128], index: 7, kind: input, shape index: {}]   ;;  %s4511_s8 = inlined_call_operand.vmem [shape: f32[1,128], index: 8, kind: input, shape index: {}]   ;;  %s4512_s9 = inlined_call_operand.vmem [shape: f32[32,4], index: 9, kind: input, shape index: {}]   ;;  %s4513_s10 = inlined_call_operand.vmem [shape: f32[1,4], index: 10, kind: input, shape index: {}]   ;;  %s4514_s11 = inlined_call_operand.vmem [shape: f32[8,4], index: 11, kind: output, shape index: {0}]  }
   0x1   :  { %3404 = vmatprep.subr.bf16.mxu1 %v3689_v0  ;;  %v58_v1 = vld [vmem:[%s4501_s3] sm:$0xff]  ;;  %v59_v2 = vld [vmem:[%s4501_s3 + $0x8] sm:$0xff]  ;;  %3133 = vmatprep.mubr.msk.f32.mxu1 %vm3690_vm1, %v3691_v4  ;;  %vm43_vm2 = vcmask 261120   ;;  %v209_v9 = vld [vmem:[%s4502_s4 + $0x10] sm:$0xff]  ;;  %vm2868_vm3 = vcmask 31744  }
   0x2   :  { %v207_v3 = vld [vmem:[%s4502_s4] sm:$0xff]  ;;  %v3400_v5 = vpack.c.bf16 %v59_v2, %v58_v1  ;;  %v208_v6 = vld [vmem:[%s4502_s4 + $0x8] sm:$0xff]  ;;  %v210_v10 = vld [vmem:[%s4502_s4 + $0x18] sm:$0xff] }
   0x3   :  { %v50_v7 = vld [vmem:[%s4503_s0] sm:$0xff]  ;;  %v3783_v8 = vpack.c.bf16 %v208_v6, %v207_v3  ;;  %v42_v12 = vld [vmem:[%s4504_s1 + $0x8] sm:$0xff]  ;;  %v3806_v14 = vpack.c.bf16 %v210_v10, %v209_v9  ;;  %v52_v36 = vld [vmem:[%s4503_s0 + $0x10] sm:$0xff] }
   0x4   :  { %3113 = vmatprep.mubr.msk.f32.mxu0 %vm67_vm0, %v50_v7  ;;  %v41_v11 = vld [vmem:[%s4504_s1] sm:$0xff]  ;;  %3401 = vmatprep.subr.bf16.mxu0 %v3400_v5  ;;  %v51_v13 = vld [vmem:[%s4503_s0 + $0x8] sm:$0xff]  ;;  %45 = vst.msk [vmem:[%s4505_s12 + $0x8] sm:$0xff] %vm43_vm2, %v42_v12  ;;  %v53_v37 = vld [vmem:[%s4503_s0 + $0x18] sm:$0xff] }
   0x5   :  { %44 = vst.msk [vmem:[%s4505_s12] sm:$0xff] %vm43_vm2, %v41_v11  ;;  %3406 = vmatpush3.bf16.msra.mxu1 %v3783_v8  ;;  %3403 = vmatpush3.bf16.msra.mxu0 %v3400_v5  ;;  %v46_v16 = vld [vmem:[%s4506_s2] sm:$0xff]  ;;  %v328_v40 = vld [vmem:[%s4509_s6 + $0x8] sm:$0xff]  ;;  %v333_v44 = vld [vmem:[%s4510_s7 + $0x10] sm:$0xff] }
   0x6   :  { %3407 = vmatprep.subr.bf16.mxu1 %v3689_v0  ;;  %3416 = vmatprep.subr.bf16.mxu0 %v3689_v0  ;;  %48 = vst.msk [vmem:[%s4507_s13] sm:$0xff] %vm43_vm2, %v46_v16  ;;  %v3833_v17 = vld [vmem:[%s4508_s5] ss:$0 sm:$0xff]  ;;  %v332_v43 = vld [vmem:[%s4510_s7 + $0x8] sm:$0xff]  ;;  %v334_v45 = vld [vmem:[%s4510_s7 + $0x18] sm:$0xff] }
   0x7   :  { %v54_v38 = vld [vmem:[%s4503_s0 + $0x20] sm:$0xff]  ;;  %v55_v47 = vld [vmem:[%s4503_s0 + $0x28] sm:$0xff]  ;;  %v3883_v48 = vpack.c.bf16 %v334_v45, %v333_v44  ;;  %v329_v50 = vld [vmem:[%s4509_s6 + $0x10] sm:$0xff] }
   0x8   :  { %3114 = vmatmul.mubr.msk.f32.vlgmr.msra.gmra.mrb[0].mxu0 %vm67_vm0, %v51_v13  ;;  %v327_v39 = vld [vmem:[%s4509_s6] sm:$0xff]  ;;  %v330_v51 = vld [vmem:[%s4509_s6 + $0x18] sm:$0xff]  ;;  %v56_v54 = vld [vmem:[%s4503_s0 + $0x30] sm:$0xff] }
   0x9   :  { %3409 = vmatpush3.bf16.msra.mxu1 %v3806_v14  ;;  %v331_v41 = vld [vmem:[%s4510_s7] sm:$0xff]  ;;  %3116 = vmatprep.mubr.msk.f32.mxu0 %vm67_vm0, %v52_v36  ;;  %v3863_v42 = vpack.c.bf16 %v328_v40, %v327_v39  ;;  %v3901_v53 = vpack.c.bf16 %v330_v51, %v329_v50  ;;  %v57_v55 = vld [vmem:[%s4503_s0 + $0x38] sm:$0xff]  ;;  %s3694_s0 = smov 64   ;;  %v47_v7 = vld [vmem:[%s4506_s2 + $0x8] sm:$0xff] }
   0xa   :  { %3410 = vmatprep.subr.bf16.mxu1 %v3689_v0  ;;  %v3875_v46 = vpack.c.bf16 %v332_v43, %v331_v41  ;;  %49 = vst.msk [vmem:[%s4507_s13 + $0x8] sm:$0xff] %vm43_vm2, %v47_v7  ;;  %v3972_v11 = vld [vmem:[%s4511_s8] ss:$0 sm:$0xff] }
   0xb   :  { %3418 = vmatpush3.bf16.msra.mxu0 %v3863_v42  ;;  %v2893_v52 = vld [vmem:[%s4505_s12 + $0x8] sm:$0xff] }
   0xc   :  { %v205_v15 = vld [vmem:[%s4505_s12] sm:$0xff]  ;;  %3117 = vmatmul.mubr.msk.f32.gmra.mrb[2].mxu0 %vm67_vm0, %v53_v37  ;;  %3419 = vmatprep.subr.bf16.mxu0 %v3689_v0 }
   0xd   :  { %3134 = vmatmul.mubr.msk.f32.vlgmr.msra.gmra.mrb[0].mxu1 %vm43_vm2, %v205_v15  ;;  %v285_v25 = vld [vmem:[%s4507_s13] sm:$0xff]  ;;  %3119 = vmatprep.mubr.msk.f32.mxu0 %vm67_vm0, %v54_v38 }
   0xe   :  { %3144 = vmatprep.mubr.msk.f32.mxu1 %vm3690_vm1, %v3691_v4  ;;  %3412 = vmatpush3.bf16.msra.mxu1 %v3875_v46 }
   0xf   :  { %3413 = vmatprep.subr.bf16.mxu1 %v3689_v0  ;;  %3421 = vmatpush3.bf16.msra.mxu0 %v3901_v53 }
  0x10   :  { %3120 = vmatmul.mubr.msk.f32.gmra.mrb[4].mxu0 %vm67_vm0, %v55_v47  ;;  %3428 = vmatprep.subr.bf16.mxu0 %v3689_v0 }
  0x11   :  { %3122 = vmatprep.mubr.msk.f32.mxu0 %vm67_vm0, %v56_v54 }
  0x12   :  { %3415 = vmatpush3.bf16.msra.mxu1 %v3883_v48 }
  0x13   :  { %3422 = vmatprep.subr.bf16.mxu1 %v3689_v0 }
  0x14   :  { %3123 = vmatmul.mubr.msk.f32.gmra.mrb[6].mxu0 %vm67_vm0, %v57_v55 }
  0x15   :  { %3145 = vmatmul.mubr.msk.f32.vlgmr.msra.gmra.mrb[2].mxu1 %vm43_vm2, %v2893_v52  ;;  %3155 = vmatprep.mubr.msk.f32.mxu0 %vm3690_vm1, %v3691_v4 }
  0x16   :  { %3424 = vmatpush3.bf16.msra.mxu1 %v3783_v8  ;;  %3166 = vmatprep.mubr.msk.f32.mxu1 %vm3690_vm1, %v3691_v4 }
  0x17   :  { %3425 = vmatprep.subr.bf16.mxu1 %v3689_v0 }
  0x1a   :  { %3427 = vmatpush3.bf16.msra.mxu1 %v3806_v14 }
  0x1b   :  { %3434 = vmatprep.subr.bf16.mxu1 %v3689_v0 }
  0xdb   :  { %v3835_v18 = vpop.f32.mrb[0].mxu0 }
  0xdc   :  { %v158_v19 = vpop.f32.mrb[1].mxu0  ;;  %v164_v9 = vadd.f32 %v3835_v18, %v3833_v17 }
  0xdd   :  { %v159_v20 = vadd.f32 %v3833_v17, %v158_v19 }
  0xdf   :  { %v3927_v59 = vpop.f32.mrb[2].mxu0 }
  0xe0   :  { %v280_v21 = vpop.f32.mrb[0].mxu1  ;;  %v3929_v60 = vpop.f32.mrb[3].mxu0 }
  0xe1   :  { %v284_v22 = vadd.f32 %v280_v21, %v159_v20  ;;  %v3135_v23 = vpop.f32.mrb[1].mxu1 }
  0xe2   :  { %v2897_v23 = vld [vmem:[%s4507_s13 + $0x8] sm:$0xff] }
  0xe3   :  { %3560 = vtanh.f32 %v284_v22  ;;  %v2892_v26 = vmul.f32 -1.442695, %v284_v22  ;;  %v3931_v61 = vpop.f32.mrb[4].mxu0 }
  0xe4   :  { %v3933_v62 = vpop.f32.mrb[5].mxu0 }
  0xe5   :  { %3562 = vpow2.f32 %v2892_v26 }
  0xe7   :  { %v3956_v5 = vpop.f32.mrb[6].mxu0 }
  0xe8   :  { %v404_v2 = vpop.f32.mrb[2].mxu1  ;;  %v3958_v6 = vpop.f32.mrb[7].mxu0 }
  0xe9   :  { %v3146_v3 = vpop.f32.mrb[3].mxu1 }
  0xed   :  { %v3561_v24 = vpop.eup %3560 }
  0xee   :  { %299 = vrot.lane.b32.xlu0 %v3561_v24, %s3692_s20 }
  0xef   :  { %v3563_v27 = vpop.eup %3562 }
  0xf0   :  { %v289_v28 = vadd.f32 1.0, %v3563_v27 }
  0xf2   :  { %294 = vrot.lane.b32.xlu0 %v285_v25, %s3692_s20  ;;  %3564 = vrcp.f32 %v289_v28 }
  0xfc   :  { %v3565_v29 = vpop.eup %3564 }
 0x160   :  { %v300_v30 = vpop.permute.xlu0 %299 }
 0x161   :  { %v302_v31 = vmul.f32 %v3565_v29, %v300_v30 }
 0x163   :  { %304 = vrot.lane.b32.xlu1 %v302_v31, %s3692_s20 }
 0x164   :  { %v295_v32 = vpop.permute.xlu0 %294 }
 0x165   :  { %v297_v33 = vmul.f32 %v3565_v29, %v295_v32 }
 0x1d5   :  { %v305_v34 = vpop.permute.xlu1 %304 }
 0x1d6   :  { %v307_v35 = vadd.f32 %v305_v34, %v297_v33 }
 0x1d8   :  { %3566 = vtanh.f32 %v307_v35 }
 0x1e2   :  { %v3567_v49 = vpop.eup %3566 }
 0x1e3   :  { %310 = vrot.lane.b32.xlu1 %v3567_v49, %s3692_s20 }
 0x1e7   :  { %320 = vrot.lane.b32.xlu1 %v307_v35, %s3693_s25 }
 0x255   :  { %v311_v56 = vpop.permute.xlu1 %310 }
 0x256   :  { %v313_v57 = vmul.f32 %v3565_v29, %v311_v56 }
 0x258   :  { %315 = vrot.lane.b32.xlu0 %v313_v57, %s3694_s0 }
 0x259   :  { %v321_v58 = vpop.permute.xlu1 %320 }
 0x25a   :  { %323 = vst.msk [vmem:[%s4507_s13] sm:$0xff] %vm43_vm2, %v321_v58 }
 0x261   :  { %v609_v18 = vld [vmem:[%s4507_s13] sm:$0xff] }
 0x2ca   :  { %v316_v63 = vpop.permute.xlu0 %315 }
 0x2cb   :  { %318 = vst.msk [vmem:[%s4505_s12] sm:$0xff] %vm43_vm2, %v316_v63 }
 0x2d2   :  { %v326_v1 = vld [vmem:[%s4505_s12] sm:$0xff] }
 0x2d3   :  { %3156 = vmatmul.mubr.msk.f32.vlgmr.msra.gmra.mrb[8].mxu0 %vm43_vm2, %v326_v1  ;;  %3167 = vmatmul.mubr.msk.f32.vlgmr.msra.gmra.mrb[4].mxu1 %vm43_vm2, %v326_v1 }
 0x2d4   :  { %3436 = vmatpush3.bf16.msra.mxu1 %v3863_v42  ;;  %3430 = vmatpush3.bf16.msra.mxu0 %v3875_v46 }
 0x2d5   :  { %3437 = vmatprep.subr.bf16.mxu1 %v3689_v0  ;;  %3431 = vmatprep.subr.bf16.mxu0 %v3689_v0 }
 0x2d6   :  { %3188 = vmatprep.mubr.msk.f32.mxu1 %vm3690_vm1, %v3691_v4  ;;  %3177 = vmatprep.mubr.msk.f32.mxu0 %vm3690_vm1, %v3691_v4 }
 0x2d8   :  { %3439 = vmatpush3.bf16.msra.mxu1 %v3901_v53  ;;  %3433 = vmatpush3.bf16.msra.mxu0 %v3883_v48 }
 0x2d9   :  { %3440 = vmatprep.subr.bf16.mxu0 %v3689_v0  ;;  %3446 = vmatprep.subr.bf16.mxu1 %v3689_v0 }
 0x3a6   :  { %v477_v10 = vpop.f32.mrb[8].mxu0  ;;  %v604_v12 = vpop.f32.mrb[4].mxu1 }
 0x3a7   :  { %v478_v13 = vadd.f32 %v477_v10, %v404_v2  ;;  %v608_v15 = vadd.f32 %v604_v12, %v164_v9  ;;  %v3157_v16 = vpop.f32.mrb[9].mxu0  ;;  %v3168_v19 = vpop.f32.mrb[5].mxu1  ;;  %v169_v12 = vadd.f32 %v3833_v17, %v3929_v60 }
 0x3a9   :  { %v488_v20 = vadd.f32 %v3972_v11, %v478_v13  ;;  %3568 = vtanh.f32 %v608_v15  ;;  %v2902_v24 = vmul.f32 -1.442695, %v608_v15 }
 0x3ab   :  { %3570 = vtanh.f32 %v488_v20  ;;  %v2898_v25 = vmul.f32 -1.442695, %v488_v20 }
 0x3ac   :  { %3572 = vpow2.f32 %v2902_v24 }
 0x3ad   :  { %3574 = vpow2.f32 %v2898_v25 }
 0x3b3   :  { %v3569_v21 = vpop.eup %3568 }
 0x3b4   :  { %623 = vrot.lane.b32.xlu1 %v3569_v21, %s3692_s20 }
 0x3b5   :  { %v3571_v22 = vpop.eup %3570 }
 0x3b6   :  { %504 = vrot.lane.b32.xlu0 %v3571_v22, %s3692_s20  ;;  %v3573_v26 = vpop.eup %3572 }
 0x3b7   :  { %v3575_v27 = vpop.eup %3574  ;;  %v613_v28 = vadd.f32 1.0, %v3573_v26 }
 0x3b8   :  { %618 = vrot.lane.b32.xlu1 %v609_v18, %s3692_s20  ;;  %v494_v29 = vadd.f32 1.0, %v3575_v27 }
 0x3b9   :  { %3576 = vrcp.f32 %v613_v28 }
 0x3ba   :  { %499 = vrot.lane.b32.xlu0 %v2897_v23, %s3692_s20  ;;  %3578 = vrcp.f32 %v494_v29 }
 0x3c3   :  { %v3577_v30 = vpop.eup %3576 }
 0x3c4   :  { %v3579_v33 = vpop.eup %3578 }
 0x426   :  { %v624_v31 = vpop.permute.xlu1 %623 }
 0x427   :  { %v626_v32 = vmul.f32 %v3577_v30, %v624_v31 }
 0x428   :  { %v505_v34 = vpop.permute.xlu0 %504 }
 0x429   :  { %v507_v35 = vmul.f32 %v3579_v33, %v505_v34  ;;  %628 = vrot.lane.b32.xlu1 %v626_v32, %s3692_s20 }
 0x42a   :  { %v619_v36 = vpop.permute.xlu1 %618 }
 0x42b   :  { %509 = vrot.lane.b32.xlu0 %v507_v35, %s3692_s20  ;;  %v621_v38 = vmul.f32 %v3577_v30, %v619_v36 }
 0x42c   :  { %v500_v37 = vpop.permute.xlu0 %499 }
 0x42d   :  { %v502_v40 = vmul.f32 %v3579_v33, %v500_v37 }
 0x49b   :  { %v629_v39 = vpop.permute.xlu1 %628 }
 0x49c   :  { %v631_v41 = vadd.f32 %v629_v39, %v621_v38 }
 0x49d   :  { %v510_v43 = vpop.permute.xlu0 %509 }
 0x49e   :  { %3580 = vtanh.f32 %v631_v41  ;;  %v512_v44 = vadd.f32 %v510_v43, %v502_v40 }
 0x4a0   :  { %3582 = vtanh.f32 %v512_v44 }
 0x4a8   :  { %v3581_v45 = vpop.eup %3580 }
 0x4a9   :  { %634 = vrot.lane.b32.xlu1 %v3581_v45, %s3692_s20 }
 0x4aa   :  { %v3583_v47 = vpop.eup %3582 }
 0x4ab   :  { %515 = vrot.lane.b32.xlu0 %v3583_v47, %s3692_s20 }
 0x51b   :  { %v635_v49 = vpop.permute.xlu1 %634 }
 0x51c   :  { %v637_v50 = vmul.f32 %v3577_v30, %v635_v49 }
 0x51d   :  { %v516_v51 = vpop.permute.xlu0 %515 }
 0x51e   :  { %v518_v52 = vmul.f32 %v3579_v33, %v516_v51  ;;  %639 = vrot.lane.b32.xlu1 %v637_v50, %s3694_s0 }
 0x520   :  { %520 = vrot.lane.b32.xlu0 %v518_v52, %s3694_s0 }
 0x522   :  { %644 = vrot.lane.b32.xlu1 %v631_v41, %s3693_s25 }
 0x524   :  { %525 = vrot.lane.b32.xlu0 %v512_v44, %s3693_s25 }
 0x590   :  { %v640_v54 = vpop.permute.xlu1 %639 }
 0x591   :  { %642 = vst.msk [vmem:[%s4505_s12] sm:$0xff] %vm43_vm2, %v640_v54 }
 0x592   :  { %v521_v55 = vpop.permute.xlu0 %520 }
 0x593   :  { %2899 = vst.msk [vmem:[%s4505_s12 + $0x8] sm:$0xff] %vm43_vm2, %v521_v55 }
 0x594   :  { %v645_v56 = vpop.permute.xlu1 %644 }
 0x595   :  { %647 = vst.msk [vmem:[%s4507_s13] sm:$0xff] %vm43_vm2, %v645_v56 }
 0x596   :  { %v526_v57 = vpop.permute.xlu0 %525 }
 0x597   :  { %2900 = vst.msk [vmem:[%s4507_s13 + $0x8] sm:$0xff] %vm43_vm2, %v526_v57 }
 0x598   :  { %v649_v58 = vld [vmem:[%s4505_s12] sm:$0xff] }
 0x599   :  { %3189 = vmatmul.mubr.msk.f32.vlgmr.msra.gmra.mrb[6].mxu1 %vm43_vm2, %v649_v58 }
 0x59a   :  { %v2903_v63 = vld [vmem:[%s4505_s12 + $0x8] sm:$0xff]  ;;  %3448 = vmatpush3.bf16.msra.mxu1 %v3875_v46  ;;  %3210 = vmatprep.mubr.msk.f32.mxu1 %vm3690_vm1, %v3691_v4 }
 0x59b   :  { %3178 = vmatmul.mubr.msk.f32.vlgmr.msra.gmra.mrb[10].mxu0 %vm43_vm2, %v2903_v63  ;;  %3449 = vmatprep.subr.bf16.mxu1 %v3689_v0 }
 0x59c   :  { %3442 = vmatpush3.bf16.msra.mxu0 %v3783_v8  ;;  %3199 = vmatprep.mubr.msk.f32.mxu0 %vm3690_vm1, %v3691_v4  ;;  %v931_v60 = vld [vmem:[%s4507_s13] sm:$0xff] }
 0x59d   :  { %3443 = vmatprep.subr.bf16.mxu0 %v3689_v0 }
 0x59e   :  { %3451 = vmatpush3.bf16.msra.mxu1 %v3883_v48  ;;  %v2907_v20 = vld [vmem:[%s4507_s13 + $0x8] sm:$0xff] }
 0x59f   :  { %3458 = vmatprep.subr.bf16.mxu1 %v3689_v0 }
 0x5a0   :  { %3445 = vmatpush3.bf16.msra.mxu0 %v3806_v14 }
 0x5a1   :  { %3452 = vmatprep.subr.bf16.mxu0 %v3689_v0 }
 0x5a3   :  { %3200 = vmatmul.mubr.msk.f32.vlgmr.msra.gmra.mrb[12].mxu0 %vm43_vm2, %v649_v58 }
 0x5a4   :  { %3454 = vmatpush3.bf16.msra.mxu0 %v3863_v42  ;;  %3221 = vmatprep.mubr.msk.f32.mxu0 %vm3690_vm1, %v3691_v4 }
 0x5a5   :  { %3455 = vmatprep.subr.bf16.mxu0 %v3689_v0 }
 0x5a8   :  { %3457 = vmatpush3.bf16.msra.mxu0 %v3901_v53 }
 0x5a9   :  { %3464 = vmatprep.subr.bf16.mxu0 %v3689_v0 }
 0x66c   :  { %v800_v1 = vpop.f32.mrb[6].mxu1 }
 0x66d   :  { %v3190_v2 = vpop.f32.mrb[7].mxu1 }
 0x66e   :  { %v727_v3 = vpop.f32.mrb[10].mxu0 }
 0x66f   :  { %v801_v7 = vadd.f32 %v800_v1, %v727_v3  ;;  %v3179_v9 = vpop.f32.mrb[11].mxu0  ;;  %v174_v1 = vadd.f32 %v3927_v59, %v3833_v17 }
 0x671   :  { %v811_v10 = vadd.f32 %v3972_v11, %v801_v7 }
 0x673   :  { %3584 = vtanh.f32 %v811_v10  ;;  %v2908_v22 = vmul.f32 -1.442695, %v811_v10 }
 0x676   :  { %v926_v13 = vpop.f32.mrb[12].mxu0 }
 0x677   :  { %v930_v15 = vadd.f32 %v926_v13, %v169_v12  ;;  %v3201_v16 = vpop.f32.mrb[13].mxu0 }
 0x679   :  { %3586 = vtanh.f32 %v930_v15  ;;  %v2912_v18 = vmul.f32 -1.442695, %v930_v15 }
 0x67a   :  { %3588 = vpow2.f32 %v2908_v22 }
 0x67b   :  { %3590 = vpow2.f32 %v2912_v18 }
 0x67d   :  { %v3585_v19 = vpop.eup %3584 }
 0x67e   :  { %826 = vrot.lane.b32.xlu0 %v3585_v19, %s3692_s20 }
 0x682   :  { %821 = vrot.lane.b32.xlu0 %v2907_v20, %s3692_s20 }
 0x683   :  { %v3587_v21 = vpop.eup %3586 }
 0x684   :  { %945 = vrot.lane.b32.xlu1 %v3587_v21, %s3692_s20  ;;  %v3589_v23 = vpop.eup %3588 }
 0x685   :  { %v816_v24 = vadd.f32 1.0, %v3589_v23  ;;  %v3591_v25 = vpop.eup %3590 }
 0x686   :  { %940 = vrot.lane.b32.xlu0 %v931_v60, %s3692_s20  ;;  %v935_v26 = vadd.f32 1.0, %v3591_v25 }
 0x687   :  { %3592 = vrcp.f32 %v816_v24 }
 0x688   :  { %3594 = vrcp.f32 %v935_v26 }
 0x691   :  { %v3593_v27 = vpop.eup %3592 }
 0x692   :  { %v3595_v30 = vpop.eup %3594 }
 0x6f0   :  { %v827_v28 = vpop.permute.xlu0 %826 }
 0x6f1   :  { %v829_v29 = vmul.f32 %v3593_v27, %v827_v28 }
 0x6f3   :  { %831 = vrot.lane.b32.xlu1 %v829_v29, %s3692_s20 }
 0x6f4   :  { %v822_v33 = vpop.permute.xlu0 %821 }
 0x6f5   :  { %v824_v34 = vmul.f32 %v3593_v27, %v822_v33 }
 0x6f6   :  { %v946_v31 = vpop.permute.xlu1 %945 }
 0x6f7   :  { %v948_v32 = vmul.f32 %v3595_v30, %v946_v31 }
 0x6f8   :  { %v941_v37 = vpop.permute.xlu0 %940 }
 0x6f9   :  { %950 = vrot.lane.b32.xlu1 %v948_v32, %s3692_s20  ;;  %v943_v38 = vmul.f32 %v3595_v30, %v941_v37 }
 0x765   :  { %v832_v35 = vpop.permute.xlu1 %831 }
 0x766   :  { %v834_v36 = vadd.f32 %v832_v35, %v824_v34 }
 0x768   :  { %3596 = vtanh.f32 %v834_v36 }
 0x76b   :  { %v951_v39 = vpop.permute.xlu1 %950 }
 0x76c   :  { %v953_v40 = vadd.f32 %v951_v39, %v943_v38 }
 0x76e   :  { %3598 = vtanh.f32 %v953_v40 }
 0x772   :  { %v3597_v41 = vpop.eup %3596 }
 0x773   :  { %837 = vrot.lane.b32.xlu0 %v3597_v41, %s3692_s20 }
 0x778   :  { %v3599_v43 = vpop.eup %3598 }
 0x779   :  { %956 = vrot.lane.b32.xlu1 %v3599_v43, %s3692_s20 }
 0x7e5   :  { %v838_v44 = vpop.permute.xlu0 %837 }
 0x7e6   :  { %v840_v45 = vmul.f32 %v3593_v27, %v838_v44 }
 0x7e8   :  { %842 = vrot.lane.b32.xlu0 %v840_v45, %s3694_s0 }
 0x7eb   :  { %v957_v47 = vpop.permute.xlu1 %956 }
 0x7ec   :  { %v959_v49 = vmul.f32 %v3595_v30, %v957_v47  ;;  %847 = vrot.lane.b32.xlu0 %v834_v36, %s3693_s25 }
 0x7ee   :  { %961 = vrot.lane.b32.xlu1 %v959_v49, %s3694_s0 }
 0x7f2   :  { %966 = vrot.lane.b32.xlu1 %v953_v40, %s3693_s25 }
 0x85a   :  { %v843_v50 = vpop.permute.xlu0 %842 }
 0x85b   :  { %2909 = vst.msk [vmem:[%s4505_s12 + $0x8] sm:$0xff] %vm43_vm2, %v843_v50 }
 0x85e   :  { %v848_v51 = vpop.permute.xlu0 %847 }
 0x85f   :  { %2910 = vst.msk [vmem:[%s4507_s13 + $0x8] sm:$0xff] %vm43_vm2, %v848_v51 }
 0x860   :  { %v962_v52 = vpop.permute.xlu1 %961 }
 0x861   :  { %964 = vst.msk [vmem:[%s4505_s12] sm:$0xff] %vm43_vm2, %v962_v52 }
 0x862   :  { %v2913_v54 = vld [vmem:[%s4505_s12 + $0x8] sm:$0xff] }
 0x863   :  { %3211 = vmatmul.mubr.msk.f32.vlgmr.msra.gmra.mrb[8].mxu1 %vm43_vm2, %v2913_v54 }
 0x864   :  { %3460 = vmatpush3.bf16.msra.mxu1 %v3783_v8  ;;  %v967_v55 = vpop.permute.xlu1 %966  ;;  %3232 = vmatprep.mubr.msk.f32.mxu1 %vm3690_vm1, %v3691_v4 }
 0x865   :  { %969 = vst.msk [vmem:[%s4507_s13] sm:$0xff] %vm43_vm2, %v967_v55  ;;  %3461 = vmatprep.subr.bf16.mxu1 %v3689_v0 }
 0x866   :  { %v2917_v16 = vld [vmem:[%s4507_s13 + $0x8] sm:$0xff] }
 0x868   :  { %3463 = vmatpush3.bf16.msra.mxu1 %v3806_v14  ;;  %v971_v56 = vld [vmem:[%s4505_s12] sm:$0xff] }
 0x869   :  { %3222 = vmatmul.mubr.msk.f32.vlgmr.msra.gmra.mrb[14].mxu0 %vm43_vm2, %v971_v56  ;;  %3470 = vmatprep.subr.bf16.mxu1 %v3689_v0 }
 0x86a   :  { %3466 = vmatpush3.bf16.msra.mxu0 %v3875_v46  ;;  %3243 = vmatprep.mubr.msk.f32.mxu0 %vm3690_vm1, %v3691_v4 }
 0x86b   :  { %3233 = vmatmul.mubr.msk.f32.vlgmr.msra.gmra.mrb[10].mxu1 %vm43_vm2, %v971_v56  ;;  %3467 = vmatprep.subr.bf16.mxu0 %v3689_v0 }
 0x86c   :  { %3472 = vmatpush3.bf16.msra.mxu1 %v3863_v42  ;;  %3254 = vmatprep.mubr.msk.f32.mxu1 %vm3690_vm1, %v3691_v4  ;;  %v1253_v59 = vld [vmem:[%s4507_s13] sm:$0xff] }
 0x86d   :  { %3473 = vmatprep.subr.bf16.mxu1 %v3689_v0 }
 0x86e   :  { %3469 = vmatpush3.bf16.msra.mxu0 %v3883_v48 }
 0x86f   :  { %3476 = vmatprep.subr.bf16.mxu0 %v3689_v0 }
 0x870   :  { %3475 = vmatpush3.bf16.msra.mxu1 %v3901_v53 }
 0x871   :  { %3482 = vmatprep.subr.bf16.mxu1 %v3689_v0 }
 0x936   :  { %v1049_v57 = vpop.f32.mrb[8].mxu1 }
 0x937   :  { %v3212_v58 = vpop.f32.mrb[9].mxu1 }
 0x93c   :  { %v1122_v63 = vpop.f32.mrb[14].mxu0 }
 0x93d   :  { %v1123_v2 = vadd.f32 %v1122_v63, %v1049_v57  ;;  %v3223_v3 = vpop.f32.mrb[15].mxu0 }
 0x93e   :  { %v1248_v7 = vpop.f32.mrb[10].mxu1 }
 0x93f   :  { %v1133_v9 = vadd.f32 %v3972_v11, %v1123_v2  ;;  %v1252_v10 = vadd.f32 %v1248_v7, %v174_v1  ;;  %v3234_v12 = vpop.f32.mrb[11].mxu1 }
 0x941   :  { %3600 = vtanh.f32 %v1133_v9  ;;  %v2918_v19 = vmul.f32 -1.442695, %v1133_v9  ;;  %v2922_v20 = vmul.f32 -1.442695, %v1252_v10 }
 0x942   :  { %3602 = vtanh.f32 %v1252_v10 }
 0x943   :  { %3604 = vpow2.f32 %v2918_v19 }
 0x944   :  { %3606 = vpow2.f32 %v2922_v20 }
 0x94b   :  { %v3601_v13 = vpop.eup %3600 }
 0x94c   :  { %v3603_v15 = vpop.eup %3602  ;;  %1148 = vrot.lane.b32.xlu0 %v3601_v13, %s3692_s20 }
 0x94d   :  { %1267 = vrot.lane.b32.xlu1 %v3603_v15, %s3692_s20  ;;  %v3605_v21 = vpop.eup %3604 }
 0x94e   :  { %v3607_v60 = vpop.eup %3606  ;;  %v1138_v22 = vadd.f32 1.0, %v3605_v21 }
 0x94f   :  { %v1257_v18 = vadd.f32 1.0, %v3607_v60 }
 0x950   :  { %1143 = vrot.lane.b32.xlu0 %v2917_v16, %s3692_s20  ;;  %3608 = vrcp.f32 %v1138_v22 }
 0x951   :  { %1262 = vrot.lane.b32.xlu1 %v1253_v59, %s3692_s20  ;;  %3610 = vrcp.f32 %v1257_v18 }
 0x95a   :  { %v3609_v23 = vpop.eup %3608 }
 0x95b   :  { %v3611_v25 = vpop.eup %3610 }
 0x9be   :  { %v1149_v24 = vpop.permute.xlu0 %1148 }
 0x9bf   :  { %v1151_v26 = vmul.f32 %v3609_v23, %v1149_v24  ;;  %v1268_v27 = vpop.permute.xlu1 %1267 }
 0x9c0   :  { %v1270_v28 = vmul.f32 %v3611_v25, %v1268_v27 }
 0x9c1   :  { %1153 = vrot.lane.b32.xlu0 %v1151_v26, %s3692_s20 }
 0x9c2   :  { %1272 = vrot.lane.b32.xlu1 %v1270_v28, %s3692_s20  ;;  %v1144_v29 = vpop.permute.xlu0 %1143 }
 0x9c3   :  { %v1263_v30 = vpop.permute.xlu1 %1262  ;;  %v1146_v31 = vmul.f32 %v3609_v23, %v1144_v29 }
 0x9c4   :  { %v1265_v32 = vmul.f32 %v3611_v25, %v1263_v30 }
 0xa33   :  { %v1154_v33 = vpop.permute.xlu0 %1153 }
 0xa34   :  { %v1156_v34 = vadd.f32 %v1154_v33, %v1146_v31  ;;  %v1273_v35 = vpop.permute.xlu1 %1272 }
 0xa35   :  { %v1275_v36 = vadd.f32 %v1273_v35, %v1265_v32 }
 0xa36   :  { %3612 = vtanh.f32 %v1156_v34 }
 0xa37   :  { %3614 = vtanh.f32 %v1275_v36 }
 0xa40   :  { %v3613_v37 = vpop.eup %3612 }
 0xa41   :  { %v3615_v38 = vpop.eup %3614  ;;  %1159 = vrot.lane.b32.xlu0 %v3613_v37, %s3692_s20 }
 0xa42   :  { %1278 = vrot.lane.b32.xlu1 %v3615_v38, %s3692_s20 }
 0xab3   :  { %v1160_v39 = vpop.permute.xlu0 %1159 }
 0xab4   :  { %v1162_v40 = vmul.f32 %v3609_v23, %v1160_v39  ;;  %v1279_v41 = vpop.permute.xlu1 %1278 }
 0xab5   :  { %v1281_v43 = vmul.f32 %v3611_v25, %v1279_v41 }
 0xab6   :  { %1164 = vrot.lane.b32.xlu0 %v1162_v40, %s3694_s0 }
 0xab7   :  { %1283 = vrot.lane.b32.xlu1 %v1281_v43, %s3694_s0 }
 0xaba   :  { %1169 = vrot.lane.b32.xlu0 %v1156_v34, %s3693_s25 }
 0xabb   :  { %1288 = vrot.lane.b32.xlu1 %v1275_v36, %s3693_s25 }
 0xb28   :  { %v1165_v44 = vpop.permute.xlu0 %1164 }
 0xb29   :  { %2919 = vst.msk [vmem:[%s4505_s12 + $0x8] sm:$0xff] %vm43_vm2, %v1165_v44  ;;  %v1284_v45 = vpop.permute.xlu1 %1283 }
 0xb2a   :  { %1286 = vst.msk [vmem:[%s4505_s12] sm:$0xff] %vm43_vm2, %v1284_v45 }
 0xb2c   :  { %v1170_v47 = vpop.permute.xlu0 %1169 }
 0xb2d   :  { %2920 = vst.msk [vmem:[%s4507_s13 + $0x8] sm:$0xff] %vm43_vm2, %v1170_v47  ;;  %v1289_v49 = vpop.permute.xlu1 %1288 }
 0xb2e   :  { %1291 = vst.msk [vmem:[%s4507_s13] sm:$0xff] %vm43_vm2, %v1289_v49 }
 0xb30   :  { %v2923_v50 = vld [vmem:[%s4505_s12 + $0x8] sm:$0xff] }
 0xb31   :  { %3244 = vmatmul.mubr.msk.f32.vlgmr.msra.gmra.mrb[16].mxu0 %vm43_vm2, %v2923_v50  ;;  %v1293_v51 = vld [vmem:[%s4505_s12] sm:$0xff] }
 0xb32   :  { %3255 = vmatmul.mubr.msk.f32.vlgmr.msra.gmra.mrb[12].mxu1 %vm43_vm2, %v1293_v51  ;;  %3478 = vmatpush3.bf16.msra.mxu0 %v3783_v8 }
 0xb33   :  { %3479 = vmatprep.subr.bf16.mxu0 %v3689_v0  ;;  %3265 = vmatprep.mubr.msk.f32.mxu0 %vm3690_vm1, %v3691_v4 }
 0xb34   :  { %3484 = vmatpush3.bf16.msra.mxu1 %v3875_v46  ;;  %3276 = vmatprep.mubr.msk.f32.mxu1 %vm3690_vm1, %v3691_v4 }
 0xb35   :  { %3485 = vmatprep.subr.bf16.mxu1 %v3689_v0 }
 0xb36   :  { %3481 = vmatpush3.bf16.msra.mxu0 %v3806_v14 }
 0xb37   :  { %3488 = vmatprep.subr.bf16.mxu0 %v3689_v0 }
 0xb38   :  { %3487 = vmatpush3.bf16.msra.mxu1 %v3883_v48 }
 0xb39   :  { %3266 = vmatmul.mubr.msk.f32.vlgmr.msra.gmra.mrb[18].mxu0 %vm43_vm2, %v1293_v51  ;;  %3494 = vmatprep.subr.bf16.mxu1 %v3689_v0 }
 0xb3a   :  { %3490 = vmatpush3.bf16.msra.mxu0 %v3863_v42  ;;  %3287 = vmatprep.mubr.msk.f32.mxu0 %vm3690_vm1, %v3691_v4  ;;  %v179_v42 = vadd.f32 %v3833_v17, %v3933_v62  ;;  %v1575_v62 = vld [vmem:[%s4507_s13] sm:$0xff] }
 0xb3b   :  { %3491 = vmatprep.subr.bf16.mxu0 %v3689_v0 }
 0xb3e   :  { %3493 = vmatpush3.bf16.msra.mxu0 %v3901_v53  ;;  %v2927_v53 = vld [vmem:[%s4507_s13 + $0x8] sm:$0xff] }
 0xb3f   :  { %3500 = vmatprep.subr.bf16.mxu0 %v3689_v0 }
 0xc04   :  { %v1371_v46 = vpop.f32.mrb[16].mxu0 }
 0xc05   :  { %v1444_v52 = vpop.f32.mrb[12].mxu1  ;;  %v3245_v54 = vpop.f32.mrb[17].mxu0 }
 0xc06   :  { %v1445_v55 = vadd.f32 %v1444_v52, %v1371_v46  ;;  %v3256_v48 = vpop.f32.mrb[13].mxu1 }
 0xc08   :  { %v1455_v56 = vadd.f32 %v3972_v11, %v1445_v55 }
 0xc0a   :  { %3616 = vtanh.f32 %v1455_v56  ;;  %v2928_v3 = vmul.f32 -1.442695, %v1455_v56 }
 0xc0c   :  { %v1570_v57 = vpop.f32.mrb[18].mxu0 }
 0xc0d   :  { %v1574_v58 = vadd.f32 %v1570_v57, %v179_v42  ;;  %v3267_v63 = vpop.f32.mrb[19].mxu0 }
 0xc0f   :  { %3618 = vtanh.f32 %v1574_v58  ;;  %v2932_v7 = vmul.f32 -1.442695, %v1574_v58 }
 0xc10   :  { %3620 = vpow2.f32 %v2928_v3 }
 0xc11   :  { %3622 = vpow2.f32 %v2932_v7 }
 0xc14   :  { %v3617_v1 = vpop.eup %3616 }
 0xc15   :  { %1470 = vrot.lane.b32.xlu0 %v3617_v1, %s3692_s20 }
 0xc19   :  { %v3619_v2 = vpop.eup %3618  ;;  %1465 = vrot.lane.b32.xlu0 %v2927_v53, %s3692_s20 }
 0xc1a   :  { %1589 = vrot.lane.b32.xlu1 %v3619_v2, %s3692_s20  ;;  %v3621_v9 = vpop.eup %3620 }
 0xc1b   :  { %v1460_v10 = vadd.f32 1.0, %v3621_v9  ;;  %v3623_v12 = vpop.eup %3622 }
 0xc1c   :  { %v1579_v13 = vadd.f32 1.0, %v3623_v12 }
 0xc1d   :  { %1584 = vrot.lane.b32.xlu0 %v1575_v62, %s3692_s20  ;;  %3624 = vrcp.f32 %v1460_v10 }
 0xc1e   :  { %3626 = vrcp.f32 %v1579_v13 }
 0xc27   :  { %v3625_v15 = vpop.eup %3624 }
 0xc28   :  { %v3627_v19 = vpop.eup %3626 }
 0xc87   :  { %v1471_v16 = vpop.permute.xlu0 %1470 }
 0xc88   :  { %v1473_v59 = vmul.f32 %v3625_v15, %v1471_v16 }
 0xc8a   :  { %1475 = vrot.lane.b32.xlu1 %v1473_v59, %s3692_s20 }
 0xc8b   :  { %v1466_v60 = vpop.permute.xlu0 %1465 }
 0xc8c   :  { %v1590_v20 = vpop.permute.xlu1 %1589  ;;  %v1468_v22 = vmul.f32 %v3625_v15, %v1466_v60  ;;  %v1938_v60 = vld [vmem:[%s4509_s6] sm:$0xff] }
 0xc8d   :  { %v1592_v21 = vmul.f32 %v3627_v19, %v1590_v20  ;;  %v1943_v20 = vld [vmem:[%s4510_s7 + $0x8] sm:$0xff] }
 0xc8f   :  { %1594 = vrot.lane.b32.xlu1 %v1592_v21, %s3692_s20  ;;  %v1585_v23 = vpop.permute.xlu0 %1584 }
 0xc90   :  { %v1587_v25 = vmul.f32 %v3627_v19, %v1585_v23  ;;  %v1944_v23 = vld [vmem:[%s4510_s7 + $0x10] sm:$0xff] }
 0xcfc   :  { %v1476_v18 = vpop.permute.xlu1 %1475 }
 0xcfd   :  { %v1478_v24 = vadd.f32 %v1476_v18, %v1468_v22  ;;  %v1939_v22 = vld [vmem:[%s4509_s6 + $0x8] sm:$0xff] }
 0xcfe   :  { %v4251_v18 = vpack.c.bf16 %v1939_v22, %v1938_v60 }
 0xcff   :  { %3628 = vtanh.f32 %v1478_v24 }
 0xd01   :  { %v1595_v26 = vpop.permute.xlu1 %1594 }
 0xd02   :  { %v1597_v27 = vadd.f32 %v1595_v26, %v1587_v25  ;;  %v1940_v26 = vld [vmem:[%s4509_s6 + $0x10] sm:$0xff] }
 0xd04   :  { %3630 = vtanh.f32 %v1597_v27 }
 0xd09   :  { %v3629_v28 = vpop.eup %3628 }
 0xd0a   :  { %1481 = vrot.lane.b32.xlu0 %v3629_v28, %s3692_s20 }
 0xd0e   :  { %v3631_v29 = vpop.eup %3630 }
 0xd0f   :  { %1600 = vrot.lane.b32.xlu1 %v3631_v29, %s3692_s20 }
 0xd7c   :  { %v1482_v30 = vpop.permute.xlu0 %1481 }
 0xd7d   :  { %v1484_v31 = vmul.f32 %v3625_v15, %v1482_v30 }
 0xd7f   :  { %1486 = vrot.lane.b32.xlu0 %v1484_v31, %s3694_s0 }
 0xd81   :  { %v1601_v32 = vpop.permute.xlu1 %1600 }
 0xd82   :  { %v1603_v33 = vmul.f32 %v3627_v19, %v1601_v32  ;;  %v1942_v19 = vld [vmem:[%s4510_s7] sm:$0xff] }
 0xd83   :  { %1491 = vrot.lane.b32.xlu0 %v1478_v24, %s3693_s25  ;;  %v4243_v21 = vpack.c.bf16 %v1943_v20, %v1942_v19  ;;  %v1945_v24 = vld [vmem:[%s4510_s7 + $0x18] sm:$0xff] }
 0xd84   :  { %1605 = vrot.lane.b32.xlu1 %v1603_v33, %s3694_s0  ;;  %v4262_v25 = vpack.c.bf16 %v1945_v24, %v1944_v23 }
 0xd88   :  { %1610 = vrot.lane.b32.xlu1 %v1597_v27, %s3693_s25  ;;  %v1941_v27 = vld [vmem:[%s4509_s6 + $0x18] sm:$0xff] }
 0xd89   :  { %v4271_v28 = vpack.c.bf16 %v1941_v27, %v1940_v26 }
 0xdf1   :  { %v1487_v34 = vpop.permute.xlu0 %1486 }
 0xdf2   :  { %2929 = vst.msk [vmem:[%s4505_s12 + $0x8] sm:$0xff] %vm43_vm2, %v1487_v34 }
 0xdf5   :  { %v1492_v35 = vpop.permute.xlu0 %1491 }
 0xdf6   :  { %2930 = vst.msk [vmem:[%s4507_s13 + $0x8] sm:$0xff] %vm43_vm2, %v1492_v35  ;;  %v1606_v36 = vpop.permute.xlu1 %1605  ;;  %v2141_v35 = vld [vmem:[%s4502_s4] sm:$0xff] }
 0xdf7   :  { %1608 = vst.msk [vmem:[%s4505_s12] sm:$0xff] %vm43_vm2, %v1606_v36  ;;  %v2142_v36 = vld [vmem:[%s4502_s4 + $0x8] sm:$0xff] }
 0xdf9   :  { %v2933_v37 = vld [vmem:[%s4505_s12 + $0x8] sm:$0xff] }
 0xdfa   :  { %3277 = vmatmul.mubr.msk.f32.vlgmr.msra.gmra.mrb[14].mxu1 %vm43_vm2, %v2933_v37  ;;  %v1611_v38 = vpop.permute.xlu1 %1610 }
 0xdfb   :  { %3496 = vmatpush3.bf16.msra.mxu1 %v3783_v8  ;;  %1613 = vst.msk [vmem:[%s4507_s13] sm:$0xff] %vm43_vm2, %v1611_v38  ;;  %3298 = vmatprep.mubr.msk.f32.mxu1 %vm3690_vm1, %v3691_v4 }
 0xdfc   :  { %3497 = vmatprep.subr.bf16.mxu1 %v3689_v0 }
 0xdfd   :  { %v2937_v52 = vld [vmem:[%s4507_s13 + $0x8] sm:$0xff] }
 0xdfe   :  { %v1615_v39 = vld [vmem:[%s4505_s12] sm:$0xff] }
 0xdff   :  { %3499 = vmatpush3.bf16.msra.mxu1 %v3806_v14  ;;  %3288 = vmatmul.mubr.msk.f32.vlgmr.msra.gmra.mrb[20].mxu0 %vm43_vm2, %v1615_v39  ;;  %v184_v14 = vadd.f32 %v3931_v61, %v3833_v17 }
 0xe00   :  { %3506 = vmatprep.subr.bf16.mxu1 %v3689_v0  ;;  %3309 = vmatprep.mubr.msk.f32.mxu0 %vm3690_vm1, %v3691_v4 }
 0xe01   :  { %3502 = vmatpush3.bf16.msra.mxu0 %v4243_v21 }
 0xe02   :  { %3299 = vmatmul.mubr.msk.f32.vlgmr.msra.gmra.mrb[16].mxu1 %vm43_vm2, %v1615_v39  ;;  %v1897_v17 = vld [vmem:[%s4507_s13] sm:$0xff]  ;;  %3503 = vmatprep.subr.bf16.mxu0 %v3689_v0  ;;  %v4303_v39 = vpack.c.bf16 %v2142_v36, %v2141_v35 }
 0xe03   :  { %3320 = vmatprep.mubr.msk.f32.mxu1 %vm3690_vm1, %v3691_v4  ;;  %3508 = vmatpush3.bf16.msra.mxu1 %v4251_v18 }
 0xe04   :  { %3509 = vmatprep.subr.bf16.mxu1 %v3689_v0 }
 0xe05   :  { %3505 = vmatpush3.bf16.msra.mxu0 %v4262_v25 }
 0xe06   :  { %3512 = vmatprep.subr.bf16.mxu0 %v3689_v0 }
 0xe07   :  { %3511 = vmatpush3.bf16.msra.mxu1 %v4271_v28 }
 0xe08   :  { %3518 = vmatprep.subr.bf16.mxu1 %v3689_v0 }
 0xecd   :  { %v1693_v8 = vpop.f32.mrb[14].mxu1 }
 0xece   :  { %v3278_v40 = vpop.f32.mrb[15].mxu1 }
 0xecf   :  { %v2144_v40 = vld [vmem:[%s4502_s4 + $0x18] sm:$0xff] }
 0xed2   :  { %v1766_v41 = vpop.f32.mrb[20].mxu0 }
 0xed3   :  { %v1767_v43 = vadd.f32 %v1766_v41, %v1693_v8  ;;  %v3289_v44 = vpop.f32.mrb[21].mxu0  ;;  %v2143_v8 = vld [vmem:[%s4502_s4 + $0x10] sm:$0xff] }
 0xed4   :  { %v4320_v44 = vpack.c.bf16 %v2144_v40, %v2143_v8 }
 0xed5   :  { %v1777_v45 = vadd.f32 %v3972_v11, %v1767_v43  ;;  %v1892_v47 = vpop.f32.mrb[16].mxu1 }
 0xed6   :  { %v1896_v49 = vadd.f32 %v1892_v47, %v184_v14  ;;  %v3300_v50 = vpop.f32.mrb[17].mxu1 }
 0xed7   :  { %3632 = vtanh.f32 %v1777_v45  ;;  %v2938_v61 = vmul.f32 -1.442695, %v1777_v45 }
 0xed8   :  { %3634 = vtanh.f32 %v1896_v49  ;;  %v2942_v54 = vmul.f32 -1.442695, %v1896_v49 }
 0xed9   :  { %3636 = vpow2.f32 %v2938_v61 }
 0xeda   :  { %3638 = vpow2.f32 %v2942_v54 }
 0xee1   :  { %v3633_v51 = vpop.eup %3632 }
 0xee2   :  { %v3635_v46 = vpop.eup %3634  ;;  %1792 = vrot.lane.b32.xlu0 %v3633_v51, %s3692_s20 }
 0xee3   :  { %1911 = vrot.lane.b32.xlu1 %v3635_v46, %s3692_s20  ;;  %v3637_v55 = vpop.eup %3636  ;;  %v4344_v46 = vld [vmem:[%s4508_s5] ss:$0 sm:$0xff] }
 0xee4   :  { %v3639_v48 = vpop.eup %3638  ;;  %v1782_v56 = vadd.f32 1.0, %v3637_v55 }
 0xee5   :  { %v1901_v42 = vadd.f32 1.0, %v3639_v48 }
 0xee6   :  { %1787 = vrot.lane.b32.xlu0 %v2937_v52, %s3692_s20  ;;  %3640 = vrcp.f32 %v1782_v56  ;;  %v189_v52 = vadd.f32 %v4344_v46, %v3958_v6 }
 0xee7   :  { %1906 = vrot.lane.b32.xlu1 %v1897_v17, %s3692_s20  ;;  %3642 = vrcp.f32 %v1901_v42 }
 0xef0   :  { %v3641_v57 = vpop.eup %3640 }
 0xef1   :  { %v3643_v63 = vpop.eup %3642 }
 0xf54   :  { %v1793_v58 = vpop.permute.xlu0 %1792 }
 0xf55   :  { %v1795_v1 = vmul.f32 %v3641_v57, %v1793_v58  ;;  %v1912_v53 = vpop.permute.xlu1 %1911 }
 0xf56   :  { %v1914_v2 = vmul.f32 %v3643_v63, %v1912_v53 }
 0xf57   :  { %1797 = vrot.lane.b32.xlu0 %v1795_v1, %s3692_s20 }
 0xf58   :  { %1916 = vrot.lane.b32.xlu1 %v1914_v2, %s3692_s20  ;;  %v1788_v62 = vpop.permute.xlu0 %1787 }
 0xf59   :  { %v1907_v3 = vpop.permute.xlu1 %1906  ;;  %v1790_v7 = vmul.f32 %v3641_v57, %v1788_v62 }
 0xf5a   :  { %v1909_v9 = vmul.f32 %v3643_v63, %v1907_v3 }
 0xfc9   :  { %v1798_v10 = vpop.permute.xlu0 %1797 }
 0xfca   :  { %v1800_v12 = vadd.f32 %v1798_v10, %v1790_v7  ;;  %v1917_v13 = vpop.permute.xlu1 %1916 }
 0xfcb   :  { %v1919_v15 = vadd.f32 %v1917_v13, %v1909_v9 }
 0xfcc   :  { %3644 = vtanh.f32 %v1800_v12 }
 0xfcd   :  { %3646 = vtanh.f32 %v1919_v15 }
 0xfd6   :  { %v3645_v16 = vpop.eup %3644 }
 0xfd7   :  { %v3647_v59 = vpop.eup %3646  ;;  %1803 = vrot.lane.b32.xlu0 %v3645_v16, %s3692_s20 }
 0xfd8   :  { %1922 = vrot.lane.b32.xlu1 %v3647_v59, %s3692_s20 }
0x1049   :  { %v1804_v29 = vpop.permute.xlu0 %1803 }
0x104a   :  { %v1806_v30 = vmul.f32 %v3641_v57, %v1804_v29  ;;  %v1923_v31 = vpop.permute.xlu1 %1922 }
0x104b   :  { %v1925_v32 = vmul.f32 %v3643_v63, %v1923_v31 }
0x104c   :  { %1808 = vrot.lane.b32.xlu0 %v1806_v30, %s3694_s0 }
0x104d   :  { %1927 = vrot.lane.b32.xlu1 %v1925_v32, %s3694_s0 }
0x1050   :  { %1813 = vrot.lane.b32.xlu0 %v1800_v12, %s3693_s25 }
0x1051   :  { %1932 = vrot.lane.b32.xlu1 %v1919_v15, %s3693_s25 }
0x10be   :  { %v1809_v33 = vpop.permute.xlu0 %1808 }
0x10bf   :  { %2939 = vst.msk [vmem:[%s4505_s12 + $0x8] sm:$0xff] %vm43_vm2, %v1809_v33  ;;  %v1928_v34 = vpop.permute.xlu1 %1927 }
0x10c0   :  { %1930 = vst.msk [vmem:[%s4505_s12] sm:$0xff] %vm43_vm2, %v1928_v34 }
0x10c2   :  { %v1814_v37 = vpop.permute.xlu0 %1813 }
0x10c3   :  { %2940 = vst.msk [vmem:[%s4507_s13 + $0x8] sm:$0xff] %vm43_vm2, %v1814_v37  ;;  %v1933_v38 = vpop.permute.xlu1 %1932  ;;  %v4411_v37 = vld [vmem:[%s4511_s8] ss:$0 sm:$0xff] }
0x10c4   :  { %1935 = vst.msk [vmem:[%s4507_s13] sm:$0xff] %vm43_vm2, %v1933_v38 }
0x10c6   :  { %v2943_v41 = vld [vmem:[%s4505_s12 + $0x8] sm:$0xff] }
0x10c7   :  { %3310 = vmatmul.mubr.msk.f32.vlgmr.msra.gmra.mrb[22].mxu0 %vm43_vm2, %v2943_v41  ;;  %v1937_v43 = vld [vmem:[%s4505_s12] sm:$0xff] }
0x10c8   :  { %3321 = vmatmul.mubr.msk.f32.vlgmr.msra.gmra.mrb[18].mxu1 %vm43_vm2, %v1937_v43  ;;  %3514 = vmatpush3.bf16.msra.mxu0 %v4303_v39 }
0x10c9   :  { %3515 = vmatprep.subr.bf16.mxu0 %v3689_v0  ;;  %3331 = vmatprep.mubr.msk.f32.mxu0 %vm3690_vm1, %v3691_v4 }
0x10ca   :  { %3520 = vmatpush3.bf16.msra.mxu1 %v4243_v21  ;;  %3342 = vmatprep.mubr.msk.f32.mxu1 %vm3690_vm1, %v3691_v4 }
0x10cb   :  { %3521 = vmatprep.subr.bf16.mxu1 %v3689_v0  ;;  %v2219_v6 = vld [vmem:[%s4507_s13] sm:$0xff] }
0x10cc   :  { %3517 = vmatpush3.bf16.msra.mxu0 %v4320_v44 }
0x10cd   :  { %3524 = vmatprep.subr.bf16.mxu0 %v3689_v0 }
0x10ce   :  { %3523 = vmatpush3.bf16.msra.mxu1 %v4262_v25 }
0x10cf   :  { %3332 = vmatmul.mubr.msk.f32.vlgmr.msra.gmra.mrb[24].mxu0 %vm43_vm2, %v1937_v43  ;;  %3530 = vmatprep.subr.bf16.mxu1 %v3689_v0 }
0x10d0   :  { %3526 = vmatpush3.bf16.msra.mxu0 %v4251_v18  ;;  %3353 = vmatprep.mubr.msk.f32.mxu0 %vm3690_vm1, %v3691_v4 }
0x10d1   :  { %3527 = vmatprep.subr.bf16.mxu0 %v3689_v0 }
0x10d4   :  { %3529 = vmatpush3.bf16.msra.mxu0 %v4271_v28 }
0x10d5   :  { %3536 = vmatprep.subr.bf16.mxu0 %v3689_v0 }
0x119a   :  { %v2015_v14 = vpop.f32.mrb[22].mxu0 }
0x119b   :  { %v2088_v45 = vpop.f32.mrb[18].mxu1  ;;  %v3311_v47 = vpop.f32.mrb[23].mxu0 }
0x119c   :  { %v2089_v49 = vadd.f32 %v2088_v45, %v2015_v14  ;;  %v3322_v50 = vpop.f32.mrb[19].mxu1 }
0x119e   :  { %v2099_v51 = vadd.f32 %v3972_v11, %v2089_v49  ;;  %v2947_v11 = vld [vmem:[%s4507_s13 + $0x8] sm:$0xff] }
0x11a0   :  { %3648 = vtanh.f32 %v2099_v51  ;;  %v2948_v56 = vmul.f32 -1.442695, %v2099_v51 }
0x11a2   :  { %v2214_v17 = vpop.f32.mrb[24].mxu0 }
0x11a3   :  { %v2218_v61 = vadd.f32 %v2214_v17, %v189_v52  ;;  %v3333_v54 = vpop.f32.mrb[25].mxu0 }
0x11a5   :  { %3650 = vtanh.f32 %v2218_v61  ;;  %v2952_v42 = vmul.f32 -1.442695, %v2218_v61 }
0x11a6   :  { %3652 = vpow2.f32 %v2948_v56 }
0x11a7   :  { %3654 = vpow2.f32 %v2952_v42 }
0x11aa   :  { %v3649_v55 = vpop.eup %3648 }
0x11ab   :  { %2114 = vrot.lane.b32.xlu0 %v3649_v55, %s3692_s20 }
0x11af   :  { %v3651_v48 = vpop.eup %3650  ;;  %2109 = vrot.lane.b32.xlu0 %v2947_v11, %s3692_s20 }
0x11b0   :  { %2233 = vrot.lane.b32.xlu1 %v3651_v48, %s3692_s20  ;;  %v3653_v57 = vpop.eup %3652 }
0x11b1   :  { %v2104_v58 = vadd.f32 1.0, %v3653_v57  ;;  %v3655_v63 = vpop.eup %3654 }
0x11b2   :  { %v2223_v1 = vadd.f32 1.0, %v3655_v63 }
0x11b3   :  { %2228 = vrot.lane.b32.xlu0 %v2219_v6, %s3692_s20  ;;  %3656 = vrcp.f32 %v2104_v58 }
0x11b4   :  { %3658 = vrcp.f32 %v2223_v1 }
0x11bd   :  { %v3657_v53 = vpop.eup %3656 }
0x11be   :  { %v3659_v3 = vpop.eup %3658 }
0x121d   :  { %v2115_v2 = vpop.permute.xlu0 %2114 }
0x121e   :  { %v2117_v62 = vmul.f32 %v3657_v53, %v2115_v2 }
0x1220   :  { %2119 = vrot.lane.b32.xlu1 %v2117_v62, %s3692_s20 }
0x1221   :  { %v2110_v10 = vpop.permute.xlu0 %2109 }
0x1222   :  { %v2234_v7 = vpop.permute.xlu1 %2233  ;;  %v2112_v12 = vmul.f32 %v3657_v53, %v2110_v10 }
0x1223   :  { %v2236_v9 = vmul.f32 %v3659_v3, %v2234_v7 }
0x1225   :  { %2238 = vrot.lane.b32.xlu1 %v2236_v9, %s3692_s20  ;;  %v2229_v15 = vpop.permute.xlu0 %2228 }
0x1226   :  { %v2231_v59 = vmul.f32 %v3659_v3, %v2229_v15 }
0x1292   :  { %v2120_v13 = vpop.permute.xlu1 %2119 }
0x1293   :  { %v2122_v16 = vadd.f32 %v2120_v13, %v2112_v12 }
0x1295   :  { %3660 = vtanh.f32 %v2122_v16 }
0x1297   :  { %v2239_v19 = vpop.permute.xlu1 %2238 }
0x1298   :  { %v2241_v20 = vadd.f32 %v2239_v19, %v2231_v59 }
0x129a   :  { %3662 = vtanh.f32 %v2241_v20 }
0x129f   :  { %v3661_v60 = vpop.eup %3660 }
0x12a0   :  { %2125 = vrot.lane.b32.xlu0 %v3661_v60, %s3692_s20 }
0x12a4   :  { %v3663_v22 = vpop.eup %3662 }
0x12a5   :  { %2244 = vrot.lane.b32.xlu1 %v3663_v22, %s3692_s20 }
0x1312   :  { %v2126_v23 = vpop.permute.xlu0 %2125 }
0x1313   :  { %v2128_v24 = vmul.f32 %v3657_v53, %v2126_v23 }
0x1315   :  { %2130 = vrot.lane.b32.xlu0 %v2128_v24, %s3694_s0 }
0x1317   :  { %v2245_v26 = vpop.permute.xlu1 %2244 }
0x1318   :  { %v2247_v27 = vmul.f32 %v3659_v3, %v2245_v26 }
0x1319   :  { %2135 = vrot.lane.b32.xlu0 %v2122_v16, %s3693_s25 }
0x131a   :  { %2249 = vrot.lane.b32.xlu1 %v2247_v27, %s3694_s0 }
0x131e   :  { %2254 = vrot.lane.b32.xlu1 %v2241_v20, %s3693_s25 }
0x1387   :  { %v2131_v29 = vpop.permute.xlu0 %2130 }
0x1388   :  { %2949 = vst.msk [vmem:[%s4505_s12 + $0x8] sm:$0xff] %vm43_vm2, %v2131_v29 }
0x138b   :  { %v2136_v30 = vpop.permute.xlu0 %2135 }
0x138c   :  { %2950 = vst.msk [vmem:[%s4507_s13 + $0x8] sm:$0xff] %vm43_vm2, %v2136_v30  ;;  %v2250_v31 = vpop.permute.xlu1 %2249 }
0x138d   :  { %2252 = vst.msk [vmem:[%s4505_s12] sm:$0xff] %vm43_vm2, %v2250_v31 }
0x138f   :  { %v2953_v32 = vld [vmem:[%s4505_s12 + $0x8] sm:$0xff] }
0x1390   :  { %3343 = vmatmul.mubr.msk.f32.vlgmr.msra.gmra.mrb[20].mxu1 %vm43_vm2, %v2953_v32  ;;  %v2255_v33 = vpop.permute.xlu1 %2254 }
0x1391   :  { %3532 = vmatpush3.bf16.msra.mxu1 %v4303_v39  ;;  %2257 = vst.msk [vmem:[%s4507_s13] sm:$0xff] %vm43_vm2, %v2255_v33  ;;  %3364 = vmatprep.mubr.msk.f32.mxu1 %vm3690_vm1, %v3691_v4  ;;  %v194_v39 = vadd.f32 %v4344_v46, %v3956_v5 }
0x1392   :  { %3533 = vmatprep.subr.bf16.mxu1 %v3689_v0 }
0x1394   :  { %v2259_v34 = vld [vmem:[%s4505_s12] sm:$0xff] }
0x1395   :  { %3535 = vmatpush3.bf16.msra.mxu1 %v4320_v44  ;;  %3354 = vmatmul.mubr.msk.f32.vlgmr.msra.gmra.mrb[26].mxu0 %vm43_vm2, %v2259_v34  ;;  %v2957_v44 = vld [vmem:[%s4507_s13 + $0x8] sm:$0xff] }
0x1396   :  { %3542 = vmatprep.subr.bf16.mxu1 %v3689_v0  ;;  %3538 = vmatpush3.bf16.msra.mxu0 %v4243_v21 }
0x1397   :  { %3539 = vmatprep.subr.bf16.mxu0 %v3689_v0  ;;  %3375 = vmatprep.mubr.msk.f32.mxu0 %vm3690_vm1, %v3691_v4 }
0x1398   :  { %3365 = vmatmul.mubr.msk.f32.vlgmr.msra.gmra.mrb[22].mxu1 %vm43_vm2, %v2259_v34  ;;  %v2541_v5 = vld [vmem:[%s4507_s13] sm:$0xff] }
0x1399   :  { %3544 = vmatpush3.bf16.msra.mxu1 %v4251_v18  ;;  %3386 = vmatprep.mubr.msk.f32.mxu1 %vm3690_vm1, %v3691_v4 }
0x139a   :  { %3545 = vmatprep.subr.bf16.mxu1 %v3689_v0  ;;  %3541 = vmatpush3.bf16.msra.mxu0 %v4262_v25 }
0x139b   :  { %3548 = vmatprep.subr.bf16.mxu0 %v3689_v0 }
0x139d   :  { %3547 = vmatpush3.bf16.msra.mxu1 %v4271_v28 }
0x1463   :  { %v2337_v21 = vpop.f32.mrb[20].mxu1 }
0x1464   :  { %v3344_v35 = vpop.f32.mrb[21].mxu1 }
0x1468   :  { %v2410_v36 = vpop.f32.mrb[26].mxu0 }
0x1469   :  { %v2411_v18 = vadd.f32 %v2410_v36, %v2337_v21  ;;  %v3355_v38 = vpop.f32.mrb[27].mxu0  ;;  %v2784_v36 = vld [vmem:[%s4512_s9] sm:$0xff] }
0x146a   :  { %v2786_v38 = vld [vmem:[%s4512_s9 + $0x10] sm:$0xff] }
0x146b   :  { %v2421_v8 = vadd.f32 %v4411_v37, %v2411_v18  ;;  %v2536_v25 = vpop.f32.mrb[22].mxu1 }
0x146c   :  { %v2540_v40 = vadd.f32 %v2536_v25, %v194_v39  ;;  %v3366_v41 = vpop.f32.mrb[23].mxu1  ;;  %v2787_v39 = vld [vmem:[%s4512_s9 + $0x18] sm:$0xff] }
0x146d   :  { %3664 = vtanh.f32 %v2421_v8  ;;  %v2958_v14 = vmul.f32 -1.442695, %v2421_v8  ;;  %v3552_v8 = vpack.c.bf16 %v2787_v39, %v2786_v38 }
0x146e   :  { %3666 = vtanh.f32 %v2540_v40  ;;  %v2962_v45 = vmul.f32 -1.442695, %v2540_v40 }
0x146f   :  { %3668 = vpow2.f32 %v2958_v14 }
0x1470   :  { %3670 = vpow2.f32 %v2962_v45 }
0x1477   :  { %v3665_v28 = vpop.eup %3664 }
0x1478   :  { %v3667_v43 = vpop.eup %3666  ;;  %2436 = vrot.lane.b32.xlu0 %v3665_v28, %s3692_s20 }
0x1479   :  { %2555 = vrot.lane.b32.xlu1 %v3667_v43, %s3692_s20  ;;  %v3669_v47 = vpop.eup %3668 }
0x147a   :  { %v3671_v49 = vpop.eup %3670  ;;  %v2426_v50 = vadd.f32 1.0, %v3669_v47 }
0x147b   :  { %v2545_v51 = vadd.f32 1.0, %v3671_v49 }
0x147c   :  { %2431 = vrot.lane.b32.xlu0 %v2957_v44, %s3692_s20  ;;  %3672 = vrcp.f32 %v2426_v50  ;;  %v2972_v44 = vld [vmem:[%s4513_s10] ss:$0 sm:$0xff] }
0x147d   :  { %2550 = vrot.lane.b32.xlu1 %v2541_v5, %s3692_s20  ;;  %3674 = vrcp.f32 %v2545_v51 }
0x1486   :  { %v3673_v46 = vpop.eup %3672 }
0x1487   :  { %v3675_v17 = vpop.eup %3674 }
0x14ea   :  { %v2437_v52 = vpop.permute.xlu0 %2436 }
0x14eb   :  { %v2439_v61 = vmul.f32 %v3673_v46, %v2437_v52  ;;  %v2556_v54 = vpop.permute.xlu1 %2555 }
0x14ec   :  { %v2558_v55 = vmul.f32 %v3675_v17, %v2556_v54 }
0x14ed   :  { %2441 = vrot.lane.b32.xlu0 %v2439_v61, %s3692_s20 }
0x14ee   :  { %2560 = vrot.lane.b32.xlu1 %v2558_v55, %s3692_s20  ;;  %v2432_v11 = vpop.permute.xlu0 %2431 }
0x14ef   :  { %v2551_v48 = vpop.permute.xlu1 %2550  ;;  %v2434_v6 = vmul.f32 %v3673_v46, %v2432_v11 }
0x14f0   :  { %v2553_v56 = vmul.f32 %v3675_v17, %v2551_v48 }
0x155f   :  { %v2442_v42 = vpop.permute.xlu0 %2441 }
0x1560   :  { %v2444_v57 = vadd.f32 %v2442_v42, %v2434_v6  ;;  %v2561_v58 = vpop.permute.xlu1 %2560 }
0x1561   :  { %v2563_v63 = vadd.f32 %v2561_v58, %v2553_v56 }
0x1562   :  { %3676 = vtanh.f32 %v2444_v57 }
0x1563   :  { %3678 = vtanh.f32 %v2563_v63 }
0x156c   :  { %v3677_v1 = vpop.eup %3676 }
0x156d   :  { %v3679_v53 = vpop.eup %3678  ;;  %2447 = vrot.lane.b32.xlu0 %v3677_v1, %s3692_s20 }
0x156e   :  { %2566 = vrot.lane.b32.xlu1 %v3679_v53, %s3692_s20 }
0x15df   :  { %v2448_v2 = vpop.permute.xlu0 %2447 }
0x15e0   :  { %v2450_v62 = vmul.f32 %v3673_v46, %v2448_v2  ;;  %v2567_v3 = vpop.permute.xlu1 %2566 }
0x15e1   :  { %v2569_v7 = vmul.f32 %v3675_v17, %v2567_v3 }
0x15e2   :  { %2452 = vrot.lane.b32.xlu0 %v2450_v62, %s3694_s0 }
0x15e3   :  { %2571 = vrot.lane.b32.xlu1 %v2569_v7, %s3694_s0 }
0x15e6   :  { %2457 = vrot.lane.b32.xlu0 %v2444_v57, %s3693_s25 }
0x1654   :  { %v2453_v9 = vpop.permute.xlu0 %2452 }
0x1655   :  { %2959 = vst.msk [vmem:[%s4505_s12 + $0x8] sm:$0xff] %vm43_vm2, %v2453_v9  ;;  %v2572_v10 = vpop.permute.xlu1 %2571 }
0x1656   :  { %2574 = vst.msk [vmem:[%s4505_s12] sm:$0xff] %vm43_vm2, %v2572_v10 }
0x1658   :  { %v2458_v12 = vpop.permute.xlu0 %2457 }
0x1659   :  { %2960 = vst.msk [vmem:[%s4507_s13 + $0x8] sm:$0xff] %vm43_vm2, %v2458_v12 }
0x165c   :  { %v2963_v13 = vld [vmem:[%s4505_s12 + $0x8] sm:$0xff] }
0x165d   :  { %3376 = vmatmul.mubr.msk.f32.vlgmr.msra.gmra.mrb[28].mxu0 %vm43_vm2, %v2963_v13  ;;  %v2581_v15 = vld [vmem:[%s4505_s12] sm:$0xff] }
0x165e   :  { %3387 = vmatmul.mubr.msk.f32.vlgmr.msra.gmra.mrb[24].mxu1 %vm43_vm2, %v2581_v15  ;;  %3397 = vmatprep.mubr.msk.f32.mxu0 %vm3690_vm1, %v3691_v4 }
0x1660   :  { %v2967_v16 = vld [vmem:[%s4507_s13 + $0x8] sm:$0xff] }
0x1661   :  { %2753 = vrot.lane.b32.xlu0 %v2967_v16, %s3692_s20 }
0x16d3   :  { %v2754_v32 = vpop.permute.xlu0 %2753 }
0x1730   :  { %v2659_v59 = vpop.f32.mrb[28].mxu0 }
0x1731   :  { %v2732_v19 = vpop.f32.mrb[24].mxu1  ;;  %v3377_v20 = vpop.f32.mrb[29].mxu0 }
0x1732   :  { %v2733_v60 = vadd.f32 %v2732_v19, %v2659_v59  ;;  %v3388_v22 = vpop.f32.mrb[25].mxu1 }
0x1734   :  { %v2743_v23 = vadd.f32 %v4411_v37, %v2733_v60  ;;  %v2785_v37 = vld [vmem:[%s4512_s9 + $0x8] sm:$0xff] }
0x1735   :  { %v3549_v18 = vpack.c.bf16 %v2785_v37, %v2784_v36 }
0x1736   :  { %3680 = vtanh.f32 %v2743_v23  ;;  %v2968_v26 = vmul.f32 -1.442695, %v2743_v23 }
0x1737   :  { %3550 = vmatpush3.bf16.msra.mxu0 %v3549_v18 }
0x1738   :  { %3682 = vpow2.f32 %v2968_v26  ;;  %3551 = vmatprep.subr.bf16.mxu0 %v3689_v0 }
0x173b   :  { %3553 = vmatpush3.bf16.msra.mxu0 %v3552_v8 }
0x1740   :  { %v3681_v24 = vpop.eup %3680 }
0x1741   :  { %2758 = vrot.lane.b32.xlu1 %v3681_v24, %s3692_s20 }
0x1742   :  { %v3683_v4 = vpop.eup %3682 }
0x1743   :  { %v2748_v27 = vadd.f32 1.0, %v3683_v4 }
0x1745   :  { %3684 = vrcp.f32 %v2748_v27 }
0x174f   :  { %v3685_v29 = vpop.eup %3684 }
0x1750   :  { %v2756_v33 = vmul.f32 %v3685_v29, %v2754_v32 }
0x17b3   :  { %v2759_v30 = vpop.permute.xlu1 %2758 }
0x17b4   :  { %v2761_v31 = vmul.f32 %v3685_v29, %v2759_v30 }
0x17b6   :  { %2763 = vrot.lane.b32.xlu1 %v2761_v31, %s3692_s20 }
0x1828   :  { %v2764_v34 = vpop.permute.xlu1 %2763 }
0x1829   :  { %v2766_v21 = vadd.f32 %v2764_v34, %v2756_v33 }
0x182b   :  { %3686 = vtanh.f32 %v2766_v21 }
0x1835   :  { %v3687_v35 = vpop.eup %3686 }
0x1836   :  { %2769 = vrot.lane.b32.xlu0 %v3687_v35, %s3692_s20 }
0x183a   :  { %2576 = vrot.lane.b32.xlu0 %v2563_v63, %s3693_s25 }
0x18a8   :  { %v2770_v25 = vpop.permute.xlu0 %2769 }
0x18a9   :  { %v2772_v40 = vmul.f32 %v3685_v29, %v2770_v25 }
0x18ab   :  { %2774 = vrot.lane.b32.xlu1 %v2772_v40, %s3694_s0 }
0x18ac   :  { %v2577_v41 = vpop.permute.xlu0 %2576 }
0x18ad   :  { %2579 = vst.msk [vmem:[%s4507_s13] sm:$0xff] %vm43_vm2, %v2577_v41 }
0x18af   :  { %2779 = vrot.lane.b32.xlu1 %v2766_v21, %s3693_s25 }
0x191d   :  { %v2775_v0 = vpop.permute.xlu1 %2774 }
0x191e   :  { %2969 = vst.msk [vmem:[%s4505_s12 + $0x8] sm:$0xff] %vm43_vm2, %v2775_v0 }
0x1921   :  { %v2780_v28 = vpop.permute.xlu1 %2779 }
0x1922   :  { %2970 = vst.msk [vmem:[%s4507_s13 + $0x8] sm:$0xff] %vm43_vm2, %v2780_v28 }
0x1925   :  { %v2971_v43 = vld [vmem:[%s4505_s12 + $0x8] sm:$0xff] }
0x1926   :  { %3398 = vmatmul.mubr.msk.f32.vlgmr.msra.gmra.mrb[30].mxu0 %vm43_vm2, %v2971_v43 }
0x19f9   :  { %v2864_v5 = vpop.f32.mrb[30].mxu0 }
0x19fa   :  { %v2865_v14 = vadd.f32 %v2972_v44, %v2864_v5  ;;  %v3399_v45 = vpop.f32.mrb[31].mxu0 }
0x19fc   :  { %2869 = vst.msk [vmem:[%s4514_s11] sm:$0xff] %vm2868_vm3, %v2865_v14 }

</bundles_post_ra>
